<compile_context>
chip_gen: v6e
topology: v6e:2x2x1
jax: 0.10.0
libtpu: 0.0.40
codegen_flags: <defaults>
</compile_context>

<pallas_src>
import jax
import jax.numpy as jnp
import numpy as np
from jax.experimental import pallas as pl
from jax.experimental.pallas import tpu as pltpu


def _round_up(x, m):
    return ((x + m - 1) // m) * m


def edge_mlp_kernel(src_ref, dest_ref, edge_ref, ub_ref,
                    w1a_ref, w1b_ref, w1c_ref, w1d_ref, b1_ref,
                    w2_ref, b2_ref, w3_ref, b3_ref, o_ref):
    # Fused concat:  [src | dest | edge | u[batch]] @ W1  ==  sum of row-block matmuls.
    h1 = jnp.dot(src_ref[...], w1a_ref[...], preferred_element_type=jnp.float32)
    h1 = h1 + jnp.dot(dest_ref[...], w1b_ref[...], preferred_element_type=jnp.float32)
    h1 = h1 + jnp.dot(edge_ref[...], w1c_ref[...], preferred_element_type=jnp.float32)
    h1 = h1 + jnp.dot(ub_ref[...], w1d_ref[...], preferred_element_type=jnp.float32)
    h1 = jnp.maximum(h1 + b1_ref[...], 0.0)            # bias + ReLU in f32 (VPU)
    # TODO(synk): Dropout is a no-op here (inference / p=0.0 semantics).
    h2 = jnp.dot(h1.astype(w2_ref.dtype), w2_ref[...], preferred_element_type=jnp.float32)
    h2 = jnp.maximum(h2 + b2_ref[...], 0.0)
    out = jnp.dot(h2.astype(w3_ref.dtype), w3_ref[...], preferred_element_type=jnp.float32)
    o_ref[...] = (out + b3_ref[...]).astype(o_ref.dtype)


def edge_model_forward(src, dest, edge_attr, u, batch, params, *,
                       tile_e=1024, compute_dtype=jnp.float32):
    """EdgeModel.forward: fused concat + 2-hidden-layer MLP.

    src, dest:  (E, Nn) f32   edge_attr: (E, Ne) f32
    u:          (G, Ng) f32 or None   batch: (E,) int32
    params: w1 (D_in,H), b1 (1,H), w2 (H,H), b2 (1,H), w3 (H,D_out), b3 (1,D_out)
    """
    E, Nn = src.shape
    Ne = edge_attr.shape[1]
    w1, w2, w3 = params["w1"], params["w2"], params["w3"]
    b1, b2, b3 = params["b1"], params["b2"], params["b3"]
    D_in, H = w1.shape
    D_out = w3.shape[1]
    Ng = D_in - 2 * Nn - Ne

    # Per-edge globals gather (cheap glue; (E, Ng) is tiny vs. the stream traffic).
    # TODO(synk): could be pulled in-kernel via an in-VMEM gather to drop one HBM pass.
    if u is not None:
        ub = u[batch]
    else:
        ub = jnp.zeros((E, Ng), src.dtype)

    # Split W1 rows to match the four input streams (fused concat).
    w1a = w1[:Nn]
    w1b = w1[Nn:2 * Nn]
    w1c = w1[2 * Nn:2 * Nn + Ne]
    w1d = w1[2 * Nn + Ne:]

    # Row tiling.  (8,128)-rule: last block dims equal the full array dims; the row tile
    # is a multiple of 8.  Clamp the tile to the padded E so small problems stay 1 step.
    tile = min(tile_e, _round_up(E, 8))
    tile = _round_up(tile, 8)
    E_pad = _round_up(E, tile)

    def pad_rows(x):
        return x if x.shape[0] == E_pad else jnp.pad(x, ((0, E_pad - x.shape[0]), (0, 0)))

    cd = jnp.dtype(compute_dtype)
    streams = [pad_rows(x).astype(cd) for x in (src, dest, edge_attr, ub)]
    weights = [w.astype(cd) for w in (w1a, w1b, w1c, w1d)]
    # Biases stay f32 (post-MXU bias/ReLU in f32).

    grid = (E_pad // tile,)

    row_spec = lambda width: pl.BlockSpec((tile, width), lambda i: (i, 0))
    full_spec = lambda r, c: pl.BlockSpec((r, c), lambda i: (0, 0))

    in_specs = [
        row_spec(Nn),            # src
        row_spec(Nn),            # dest
        row_spec(Ne),            # edge_attr
        row_spec(Ng),            # u[batch]
        full_spec(Nn, H),        # w1a
        full_spec(Nn, H),        # w1b
        full_spec(Ne, H),        # w1c
        full_spec(Ng, H),        # w1d
        full_spec(1, H),         # b1
        full_spec(H, H),         # w2
        full_spec(1, H),         # b2
        full_spec(H, D_out),     # w3
        full_spec(1, D_out),     # b3
    ]
    out_spec = pl.BlockSpec((tile, D_out), lambda i: (i, 0))

    # Advisory cost estimate (helps XLA overlap this call with neighboring HBM work).
    itemsize = cd.itemsize
    flops = int(2 * E_pad * (D_in * H + H * H + H * D_out))
    bytes_accessed = int(
        E_pad * (2 * Nn + Ne + Ng) * itemsize            # input streams
        + (D_in * H + H * H + H * D_out) * itemsize      # weights
        + (2 * H + D_out) * 4                            # biases (f32)
        + E_pad * D_out * 4                              # output (f32)
    )
    cost = pl.CostEstimate(flops=flops, transcendentals=0, bytes_accessed=bytes_accessed)

    out = pl.pallas_call(
        edge_mlp_kernel,
        out_shape=jax.ShapeDtypeStruct((E_pad, D_out), jnp.float32),
        grid_spec=pltpu.PrefetchScalarGridSpec(
            num_scalar_prefetch=0,
            grid=grid,
            in_specs=in_specs,
            out_specs=out_spec,
        ),
        compiler_params=pltpu.CompilerParams(dimension_semantics=("parallel",)),
        cost_estimate=cost,
    )(
        streams[0], streams[1], streams[2], streams[3],
        weights[0], weights[1], weights[2], weights[3], b1,
        w2.astype(cd), b2,
        w3.astype(cd), b3,
    )
    return out[:E]


def init_params(key, in_size, hidden, out_size):
    """Deterministic init mirroring nn.Linear shapes (U[-1/sqrt(fan_in), 1/sqrt(fan_in)])."""
    ks = jax.random.split(key, 6)

    def lin(kw, kb, fan_in, fan_out):
        bound = 1.0 / float(np.sqrt(fan_in))
        w = jax.random.uniform(kw, (fan_in, fan_out), jnp.float32, -bound, bound)
        b = jax.random.uniform(kb, (1, fan_out), jnp.float32, -bound, bound)
        return w, b

    w1, b1 = lin(ks[0], ks[1], in_size, hidden)
    w2, b2 = lin(ks[2], ks[3], hidden, hidden)
    w3, b3 = lin(ks[4], ks[5], hidden, out_size)
    return {"w1": w1, "b1": b1, "w2": w2, "b2": b2, "w3": w3, "b3": b3}


def reference_forward(src, dest, edge_attr, u, batch, params):
    x = jnp.concatenate([src, dest, edge_attr, u[batch]], axis=-1)
    h1 = jnp.maximum(x @ params["w1"] + params["b1"], 0.0)
    h2 = jnp.maximum(h1 @ params["w2"] + params["b2"], 0.0)
    return h2 @ params["w3"] + params["b3"]


if __name__ == "__main__":
    key = jax.random.PRNGKey(0)

    # Small, module-consistent shapes (E not a multiple of 8 to exercise row padding).
    node_input_size = 8
    edge_input_size = 8
    global_input_size = 8
    hidden_size = 32
    edge_output_size = 16
    num_graphs = 2
    num_edges = 300

    edge_mlp_in = 2 * node_input_size + edge_input_size + global_input_size  # 32

    k_src, k_dst, k_edge, k_u, k_p = jax.random.split(key, 5)
    src = jax.random.normal(k_src, (num_edges, node_input_size), jnp.float32)
    dest = jax.random.normal(k_dst, (num_edges, node_input_size), jnp.float32)
    edge_attr = jax.random.normal(k_edge, (num_edges, edge_input_size), jnp.float32)
    u = jax.random.normal(k_u, (num_graphs, global_input_size), jnp.float32)
    batch = jnp.concatenate(
        [jnp.zeros(num_edges // 2, jnp.int32), jnp.ones(num_edges - num_edges // 2, jnp.int32)]
    )

    params = init_params(k_p, edge_mlp_in, hidden_size, edge_output_size)
    ref = reference_forward(src, dest, edge_attr, u, batch, params)

    # f32 path — matches the reference closely.
    out_f32 = edge_model_forward(src, dest, edge_attr, u, batch, params,
                                 compute_dtype=jnp.float32)
    out_f32 = jax.block_until_ready(out_f32)
    assert out_f32.shape == (num_edges, edge_output_size)
    assert jnp.allclose(out_f32, ref, atol=1e-5, rtol=1e-5)

    # bf16 operands + f32 accumulation (HBM-traffic win on v6e/v7x) — looser tolerance.
    out_bf16 = edge_model_forward(src, dest, edge_attr, u, batch, params,
                                  compute_dtype=jnp.bfloat16)
    out_bf16 = jax.block_until_ready(out_bf16)
    assert out_bf16.shape == (num_edges, edge_output_size)
    assert jnp.allclose(out_bf16, ref, atol=1e-1, rtol=1e-1)

    print("KERNEL_OK")
</pallas_src>

<mosaic_0001>
module attributes {stable_mosaic.version = 11 : i64} {
  func.func @edge_mlp_kernel(%arg0: i32, %arg1: memref<304x8xf32, #tpu.memory_space<vmem>>, %arg2: memref<304x8xf32, #tpu.memory_space<vmem>>, %arg3: memref<304x8xf32, #tpu.memory_space<vmem>>, %arg4: memref<304x8xf32, #tpu.memory_space<vmem>>, %arg5: memref<8x32xf32, #tpu.memory_space<vmem>>, %arg6: memref<8x32xf32, #tpu.memory_space<vmem>>, %arg7: memref<8x32xf32, #tpu.memory_space<vmem>>, %arg8: memref<8x32xf32, #tpu.memory_space<vmem>>, %arg9: memref<1x32xf32, #tpu.memory_space<vmem>>, %arg10: memref<32x32xf32, #tpu.memory_space<vmem>>, %arg11: memref<1x32xf32, #tpu.memory_space<vmem>>, %arg12: memref<32x16xf32, #tpu.memory_space<vmem>>, %arg13: memref<1x16xf32, #tpu.memory_space<vmem>>, %arg14: memref<304x16xf32, #tpu.memory_space<vmem>>) attributes {dimension_semantics = [#tpu.dimension_semantics<parallel>], iteration_bounds = array<i64: 1>, scalar_prefetch = 0 : i64, scratch_operands = 0 : i64, tpu.core_type = #tpu.core_type<tc>, window_params = [{transform_indices = @transform_0, window_bounds = array<i64: 304, 8>}, {transform_indices = @transform_1, window_bounds = array<i64: 304, 8>}, {transform_indices = @transform_2, window_bounds = array<i64: 304, 8>}, {transform_indices = @transform_3, window_bounds = array<i64: 304, 8>}, {pipeline_mode = #tpu.pipeline_mode<synchronous>, transform_indices = @transform_4, window_bounds = array<i64: 8, 32>}, {pipeline_mode = #tpu.pipeline_mode<synchronous>, transform_indices = @transform_5, window_bounds = array<i64: 8, 32>}, {pipeline_mode = #tpu.pipeline_mode<synchronous>, transform_indices = @transform_6, window_bounds = array<i64: 8, 32>}, {pipeline_mode = #tpu.pipeline_mode<synchronous>, transform_indices = @transform_7, window_bounds = array<i64: 8, 32>}, {pipeline_mode = #tpu.pipeline_mode<synchronous>, transform_indices = @transform_8, window_bounds = array<i64: 1, 32>}, {pipeline_mode = #tpu.pipeline_mode<synchronous>, transform_indices = @transform_9, window_bounds = array<i64: 32, 32>}, {pipeline_mode = #tpu.pipeline_mode<synchronous>, transform_indices = @transform_10, window_bounds = array<i64: 1, 32>}, {pipeline_mode = #tpu.pipeline_mode<synchronous>, transform_indices = @transform_11, window_bounds = array<i64: 32, 16>}, {pipeline_mode = #tpu.pipeline_mode<synchronous>, transform_indices = @transform_12, window_bounds = array<i64: 1, 16>}, {transform_indices = @transform_13, window_bounds = array<i64: 304, 16>}]} {
    %c0 = arith.constant 0 : index
    %c0_0 = arith.constant 0 : index
    %0 = vector.load %arg1[%c0, %c0_0] : memref<304x8xf32, #tpu.memory_space<vmem>>, vector<304x8xf32>
    %c0_1 = arith.constant 0 : index
    %c0_2 = arith.constant 0 : index
    %1 = vector.load %arg5[%c0_1, %c0_2] : memref<8x32xf32, #tpu.memory_space<vmem>>, vector<8x32xf32>
    %cst = arith.constant dense<0.000000e+00> : vector<304x32xf32>
    %2 = tpu.matmul %0, %1, %cst {dimension_numbers = #tpu.dot_dimension_numbers<[1], [0], [0], [1], [0, 0, 1, 1], [], []>} : vector<304x8xf32>, vector<8x32xf32>, vector<304x32xf32> -> vector<304x32xf32>
    %c0_3 = arith.constant 0 : index
    %c0_4 = arith.constant 0 : index
    %3 = vector.load %arg2[%c0_3, %c0_4] : memref<304x8xf32, #tpu.memory_space<vmem>>, vector<304x8xf32>
    %c0_5 = arith.constant 0 : index
    %c0_6 = arith.constant 0 : index
    %4 = vector.load %arg6[%c0_5, %c0_6] : memref<8x32xf32, #tpu.memory_space<vmem>>, vector<8x32xf32>
    %cst_7 = arith.constant dense<0.000000e+00> : vector<304x32xf32>
    %5 = tpu.matmul %3, %4, %cst_7 {dimension_numbers = #tpu.dot_dimension_numbers<[1], [0], [0], [1], [0, 0, 1, 1], [], []>} : vector<304x8xf32>, vector<8x32xf32>, vector<304x32xf32> -> vector<304x32xf32>
    %6 = arith.addf %2, %5 : vector<304x32xf32>
    %c0_8 = arith.constant 0 : index
    %c0_9 = arith.constant 0 : index
    %7 = vector.load %arg3[%c0_8, %c0_9] : memref<304x8xf32, #tpu.memory_space<vmem>>, vector<304x8xf32>
    %c0_10 = arith.constant 0 : index
    %c0_11 = arith.constant 0 : index
    %8 = vector.load %arg7[%c0_10, %c0_11] : memref<8x32xf32, #tpu.memory_space<vmem>>, vector<8x32xf32>
    %cst_12 = arith.constant dense<0.000000e+00> : vector<304x32xf32>
    %9 = tpu.matmul %7, %8, %cst_12 {dimension_numbers = #tpu.dot_dimension_numbers<[1], [0], [0], [1], [0, 0, 1, 1], [], []>} : vector<304x8xf32>, vector<8x32xf32>, vector<304x32xf32> -> vector<304x32xf32>
    %10 = arith.addf %6, %9 : vector<304x32xf32>
    %c0_13 = arith.constant 0 : index
    %c0_14 = arith.constant 0 : index
    %11 = vector.load %arg4[%c0_13, %c0_14] : memref<304x8xf32, #tpu.memory_space<vmem>>, vector<304x8xf32>
    %c0_15 = arith.constant 0 : index
    %c0_16 = arith.constant 0 : index
    %12 = vector.load %arg8[%c0_15, %c0_16] : memref<8x32xf32, #tpu.memory_space<vmem>>, vector<8x32xf32>
    %cst_17 = arith.constant dense<0.000000e+00> : vector<304x32xf32>
    %13 = tpu.matmul %11, %12, %cst_17 {dimension_numbers = #tpu.dot_dimension_numbers<[1], [0], [0], [1], [0, 0, 1, 1], [], []>} : vector<304x8xf32>, vector<8x32xf32>, vector<304x32xf32> -> vector<304x32xf32>
    %14 = arith.addf %10, %13 : vector<304x32xf32>
    %c0_18 = arith.constant 0 : index
    %c0_19 = arith.constant 0 : index
    %15 = vector.load %arg9[%c0_18, %c0_19] : memref<1x32xf32, #tpu.memory_space<vmem>>, vector<1x32xf32>
    %16 = vector.broadcast %15 : vector<1x32xf32> to vector<304x32xf32>
    %17 = arith.addf %14, %16 : vector<304x32xf32>
    %cst_20 = arith.constant 0.000000e+00 : f32
    %18 = vector.broadcast %cst_20 : f32 to vector<304x32xf32>
    %19 = arith.maximumf %17, %18 : vector<304x32xf32>
    %c0_21 = arith.constant 0 : index
    %c0_22 = arith.constant 0 : index
    %20 = vector.load %arg10[%c0_21, %c0_22] : memref<32x32xf32, #tpu.memory_space<vmem>>, vector<32x32xf32>
    %cst_23 = arith.constant dense<0.000000e+00> : vector<304x32xf32>
    %21 = tpu.matmul %19, %20, %cst_23 {dimension_numbers = #tpu.dot_dimension_numbers<[1], [0], [0], [1], [0, 0, 1, 1], [], []>} : vector<304x32xf32>, vector<32x32xf32>, vector<304x32xf32> -> vector<304x32xf32>
    %c0_24 = arith.constant 0 : index
    %c0_25 = arith.constant 0 : index
    %22 = vector.load %arg11[%c0_24, %c0_25] : memref<1x32xf32, #tpu.memory_space<vmem>>, vector<1x32xf32>
    %23 = vector.broadcast %22 : vector<1x32xf32> to vector<304x32xf32>
    %24 = arith.addf %21, %23 : vector<304x32xf32>
    %cst_26 = arith.constant 0.000000e+00 : f32
    %25 = vector.broadcast %cst_26 : f32 to vector<304x32xf32>
    %26 = arith.maximumf %24, %25 : vector<304x32xf32>
    %c0_27 = arith.constant 0 : index
    %c0_28 = arith.constant 0 : index
    %27 = vector.load %arg12[%c0_27, %c0_28] : memref<32x16xf32, #tpu.memory_space<vmem>>, vector<32x16xf32>
    %cst_29 = arith.constant dense<0.000000e+00> : vector<304x16xf32>
    %28 = tpu.matmul %26, %27, %cst_29 {dimension_numbers = #tpu.dot_dimension_numbers<[1], [0], [0], [1], [0, 0, 1, 1], [], []>} : vector<304x32xf32>, vector<32x16xf32>, vector<304x16xf32> -> vector<304x16xf32>
    %c0_30 = arith.constant 0 : index
    %c0_31 = arith.constant 0 : index
    %29 = vector.load %arg13[%c0_30, %c0_31] : memref<1x16xf32, #tpu.memory_space<vmem>>, vector<1x16xf32>
    %30 = vector.broadcast %29 : vector<1x16xf32> to vector<304x16xf32>
    %31 = arith.addf %28, %30 : vector<304x16xf32>
    %c0_32 = arith.constant 0 : index
    %c0_33 = arith.constant 0 : index
    %32 = vector.load %arg14[%c0_32, %c0_33] : memref<304x16xf32, #tpu.memory_space<vmem>>, vector<304x16xf32>
    tpu.vector_store %arg14[%c0_32, %c0_33], %31 {strides = array<i32>} : memref<304x16xf32, #tpu.memory_space<vmem>>, vector<304x16xf32>,
    return
  }
  func.func @transform_0(%arg0: i32) -> (i32, i32) {
    %c0_i32 = arith.constant 0 : i32
    %c0_i32_0 = arith.constant 0 : i32
    return %arg0, %c0_i32 : i32, i32
  }
  func.func @transform_1(%arg0: i32) -> (i32, i32) {
    %c0_i32 = arith.constant 0 : i32
    %c0_i32_0 = arith.constant 0 : i32
    return %arg0, %c0_i32 : i32, i32
  }
  func.func @transform_2(%arg0: i32) -> (i32, i32) {
    %c0_i32 = arith.constant 0 : i32
    %c0_i32_0 = arith.constant 0 : i32
    return %arg0, %c0_i32 : i32, i32
  }
  func.func @transform_3(%arg0: i32) -> (i32, i32) {
    %c0_i32 = arith.constant 0 : i32
    %c0_i32_0 = arith.constant 0 : i32
    return %arg0, %c0_i32 : i32, i32
  }
  func.func @transform_4(%arg0: i32) -> (i32, i32) {
    %c0_i32 = arith.constant 0 : i32
    %c0_i32_0 = arith.constant 0 : i32
    %c0_i32_1 = arith.constant 0 : i32
    return %c0_i32, %c0_i32_0 : i32, i32
  }
  func.func @transform_5(%arg0: i32) -> (i32, i32) {
    %c0_i32 = arith.constant 0 : i32
    %c0_i32_0 = arith.constant 0 : i32
    %c0_i32_1 = arith.constant 0 : i32
    return %c0_i32, %c0_i32_0 : i32, i32
  }
  func.func @transform_6(%arg0: i32) -> (i32, i32) {
    %c0_i32 = arith.constant 0 : i32
    %c0_i32_0 = arith.constant 0 : i32
    %c0_i32_1 = arith.constant 0 : i32
    return %c0_i32, %c0_i32_0 : i32, i32
  }
  func.func @transform_7(%arg0: i32) -> (i32, i32) {
    %c0_i32 = arith.constant 0 : i32
    %c0_i32_0 = arith.constant 0 : i32
    %c0_i32_1 = arith.constant 0 : i32
    return %c0_i32, %c0_i32_0 : i32, i32
  }
  func.func @transform_8(%arg0: i32) -> (i32, i32) {
    %c0_i32 = arith.constant 0 : i32
    %c0_i32_0 = arith.constant 0 : i32
    %c0_i32_1 = arith.constant 0 : i32
    return %c0_i32, %c0_i32_0 : i32, i32
  }
  func.func @transform_9(%arg0: i32) -> (i32, i32) {
    %c0_i32 = arith.constant 0 : i32
    %c0_i32_0 = arith.constant 0 : i32
    %c0_i32_1 = arith.constant 0 : i32
    return %c0_i32, %c0_i32_0 : i32, i32
  }
  func.func @transform_10(%arg0: i32) -> (i32, i32) {
    %c0_i32 = arith.constant 0 : i32
    %c0_i32_0 = arith.constant 0 : i32
    %c0_i32_1 = arith.constant 0 : i32
    return %c0_i32, %c0_i32_0 : i32, i32
  }
  func.func @transform_11(%arg0: i32) -> (i32, i32) {
    %c0_i32 = arith.constant 0 : i32
    %c0_i32_0 = arith.constant 0 : i32
    %c0_i32_1 = arith.constant 0 : i32
    return %c0_i32, %c0_i32_0 : i32, i32
  }
  func.func @transform_12(%arg0: i32) -> (i32, i32) {
    %c0_i32 = arith.constant 0 : i32
    %c0_i32_0 = arith.constant 0 : i32
    %c0_i32_1 = arith.constant 0 : i32
    return %c0_i32, %c0_i32_0 : i32, i32
  }
  func.func @transform_13(%arg0: i32) -> (i32, i32) {
    %c0_i32 = arith.constant 0 : i32
    %c0_i32_0 = arith.constant 0 : i32
    return %arg0, %c0_i32 : i32, i32
  }
}

</mosaic_0001>

<bundles_post_ra>
// kernel: tpu_custom_call.1
= control target key start
LH: loop header
LB: loop body
LE: loop exit
PB: predicated region body
PF: predicated region fallthrough
CT: control target
= control target key end

     0   :  { %vm122_vm0 = vcmask 64512   ;;  %vm1847_vm1 = vcmask 261120   ;;  %vm2635_vm2 = vcmask 130048   ;;  %s4703_s5 = inlined_call_operand.vmem [shape: f32[8,32], index: 5, kind: input, shape index: {}]   ;;  %s4704_s4 = inlined_call_operand.vmem [shape: f32[8,32], index: 4, kind: input, shape index: {}]   ;;  %s4705_s1 = inlined_call_operand.vmem [shape: f32[304,8], index: 1, kind: input, shape index: {}]   ;;  %s4706_s0 = inlined_call_operand.vmem [shape: f32[304,8], index: 0, kind: input, shape index: {}]   ;;  %s4707_s6 = inlined_call_operand.vmem [shape: f32[8,32], index: 6, kind: input, shape index: {}]   ;;  %s4708_s7 = inlined_call_operand.vmem [shape: f32[8,32], index: 7, kind: input, shape index: {}]   ;;  %s4709_s2 = inlined_call_operand.vmem [shape: f32[304,8], index: 2, kind: input, shape index: {}]   ;;  %s4710_s3 = inlined_call_operand.vmem [shape: f32[304,8], index: 3, kind: input, shape index: {}]   ;;  %s4711_s9 = inlined_call_operand.vmem [shape: f32[32,32], index: 9, kind: input, shape index: {}]   ;;  %s4712_s11 = inlined_call_operand.vmem [shape: f32[32,16], index: 11, kind: input, shape index: {}]   ;;  %s4713_s8 = inlined_call_operand.vmem [shape: f32[1,32], index: 8, kind: input, shape index: {}]   ;;  %s4714_s10 = inlined_call_operand.vmem [shape: f32[1,32], index: 10, kind: input, shape index: {}]   ;;  %s4715_s12 = inlined_call_operand.vmem [shape: f32[1,16], index: 12, kind: input, shape index: {}]   ;;  %s4716_s13 = inlined_call_operand.vmem [shape: f32[304,16], index: 13, kind: output, shape index: {}]  }
   0x1   :  { %v121_v0 = vld [vmem:[%s4703_s5] sm:$0xff]  ;;  %v84_v4 = vld [vmem:[%s4705_s1 + $0x8] sm:$0xff]  ;;  %v85_v8 = vld [vmem:[%s4705_s1 + $0x10] sm:$0xff] }
   0x2   :  { %v82_v1 = vld [vmem:[%s4704_s4] sm:$0xff]  ;;  %3149 = vmatprep.subr.mxu0 %v121_v0  ;;  %v45_v5 = vld [vmem:[%s4706_s0 + $0x8] sm:$0xff]  ;;  %v46_v9 = vld [vmem:[%s4706_s0 + $0x10] sm:$0xff] }
   0x3   :  { %v83_v2 = vld [vmem:[%s4705_s1] sm:$0xff]  ;;  %3208 = vmatprep.subr.mxu1 %v82_v1  ;;  %3150 = vmatpush3.msra.mxu0 %v121_v0  ;;  %v86_v10 = vld [vmem:[%s4705_s1 + $0x18] sm:$0xff]  ;;  %v88_v14 = vld [vmem:[%s4705_s1 + $0x28] sm:$0xff] }
   0x4   :  { %v44_v3 = vld [vmem:[%s4706_s0] sm:$0xff]  ;;  %3151 = vmatprep.mubr.msk.f32.mxu0 %vm122_vm0, %v83_v2  ;;  %3209 = vmatpush3.msra.mxu1 %v82_v1  ;;  %v47_v11 = vld [vmem:[%s4706_s0 + $0x18] sm:$0xff]  ;;  %v49_v15 = vld [vmem:[%s4706_s0 + $0x28] sm:$0xff] }
   0x5   :  { %v899_v6 = vld [vmem:[%s4707_s6] sm:$0xff]  ;;  %3210 = vmatprep.mubr.msk.f32.mxu1 %vm122_vm0, %v44_v3  ;;  %3152 = vmatmul.mubr.msk.f32.vlgmr.msra.gmra.mxu0 %vm122_vm0, %v84_v4  ;;  %v89_v16 = vld [vmem:[%s4705_s1 + $0x30] sm:$0xff]  ;;  %v90_v18 = vld [vmem:[%s4705_s1 + $0x38] sm:$0xff] }
   0x6   :  { %v1345_v7 = vld [vmem:[%s4708_s7] sm:$0xff]  ;;  %3211 = vmatmul.mubr.msk.f32.vlgmr.msra.gmra.mxu1 %vm122_vm0, %v45_v5  ;;  %3267 = vmatprep.subr.mxu0 %v899_v6  ;;  %v50_v17 = vld [vmem:[%s4706_s0 + $0x30] sm:$0xff]  ;;  %v51_v19 = vld [vmem:[%s4706_s0 + $0x38] sm:$0xff] }
   0x7   :  { %3326 = vmatprep.subr.mxu1 %v1345_v7  ;;  %3268 = vmatpush3.msra.mxu0 %v899_v6  ;;  %v87_v12 = vld [vmem:[%s4705_s1 + $0x20] sm:$0xff]  ;;  %v92_v22 = vld [vmem:[%s4705_s1 + $0x48] sm:$0xff]  ;;  %v93_v24 = vld [vmem:[%s4705_s1 + $0x50] sm:$0xff] }
   0x8   :  { %3154 = vmatprep.mubr.msk.f32.mxu0 %vm122_vm0, %v85_v8  ;;  %v48_v13 = vld [vmem:[%s4706_s0 + $0x20] sm:$0xff]  ;;  %3213 = vmatprep.mubr.msk.f32.mxu1 %vm122_vm0, %v46_v9  ;;  %v53_v23 = vld [vmem:[%s4706_s0 + $0x48] sm:$0xff]  ;;  %v54_v25 = vld [vmem:[%s4706_s0 + $0x50] sm:$0xff] }
   0x9   :  { %3327 = vmatpush3.msra.mxu1 %v1345_v7  ;;  %3155 = vmatmul.mubr.msk.f32.gmra.mxu0 %vm122_vm0, %v86_v10  ;;  %v91_v20 = vld [vmem:[%s4705_s1 + $0x40] sm:$0xff]  ;;  %v94_v26 = vld [vmem:[%s4705_s1 + $0x58] sm:$0xff]  ;;  %v96_v30 = vld [vmem:[%s4705_s1 + $0x68] sm:$0xff] }
   0xa   :  { %3214 = vmatmul.mubr.msk.f32.gmra.mxu1 %vm122_vm0, %v47_v11  ;;  %3157 = vmatprep.mubr.msk.f32.mxu0 %vm122_vm0, %v87_v12  ;;  %v52_v21 = vld [vmem:[%s4706_s0 + $0x40] sm:$0xff]  ;;  %v55_v27 = vld [vmem:[%s4706_s0 + $0x58] sm:$0xff]  ;;  %v57_v31 = vld [vmem:[%s4706_s0 + $0x68] sm:$0xff] }
   0xb   :  { %3216 = vmatprep.mubr.msk.f32.mxu1 %vm122_vm0, %v48_v13  ;;  %v95_v28 = vld [vmem:[%s4705_s1 + $0x60] sm:$0xff]  ;;  %v97_v32 = vld [vmem:[%s4705_s1 + $0x70] sm:$0xff]  ;;  %v98_v34 = vld [vmem:[%s4705_s1 + $0x78] sm:$0xff] }
   0xc   :  { %v56_v29 = vld [vmem:[%s4706_s0 + $0x60] sm:$0xff]  ;;  %v58_v33 = vld [vmem:[%s4706_s0 + $0x70] sm:$0xff]  ;;  %v59_v35 = vld [vmem:[%s4706_s0 + $0x78] sm:$0xff] }
   0xd   :  { %3158 = vmatmul.mubr.msk.f32.gmra.mxu0 %vm122_vm0, %v88_v14  ;;  %v99_v36 = vld [vmem:[%s4705_s1 + $0x80] sm:$0xff]  ;;  %v100_v38 = vld [vmem:[%s4705_s1 + $0x88] sm:$0xff]  ;;  %v101_v40 = vld [vmem:[%s4705_s1 + $0x90] sm:$0xff] }
   0xe   :  { %3217 = vmatmul.mubr.msk.f32.gmra.mxu1 %vm122_vm0, %v49_v15  ;;  %3160 = vmatprep.mubr.msk.f32.mxu0 %vm122_vm0, %v89_v16  ;;  %v60_v37 = vld [vmem:[%s4706_s0 + $0x80] sm:$0xff]  ;;  %v61_v39 = vld [vmem:[%s4706_s0 + $0x88] sm:$0xff]  ;;  %v62_v41 = vld [vmem:[%s4706_s0 + $0x90] sm:$0xff] }
   0xf   :  { %3219 = vmatprep.mubr.msk.f32.mxu1 %vm122_vm0, %v50_v17  ;;  %v102_v42 = vld [vmem:[%s4705_s1 + $0x98] sm:$0xff]  ;;  %v103_v44 = vld [vmem:[%s4705_s1 + $0xa0] sm:$0xff]  ;;  %v104_v46 = vld [vmem:[%s4705_s1 + $0xa8] sm:$0xff] }
  0x10   :  { %v63_v43 = vld [vmem:[%s4706_s0 + $0x98] sm:$0xff]  ;;  %v64_v45 = vld [vmem:[%s4706_s0 + $0xa0] sm:$0xff]  ;;  %v65_v47 = vld [vmem:[%s4706_s0 + $0xa8] sm:$0xff] }
  0x11   :  { %3161 = vmatmul.mubr.msk.f32.gmra.mxu0 %vm122_vm0, %v90_v18  ;;  %v105_v48 = vld [vmem:[%s4705_s1 + $0xb0] sm:$0xff]  ;;  %v106_v50 = vld [vmem:[%s4705_s1 + $0xb8] sm:$0xff]  ;;  %v107_v52 = vld [vmem:[%s4705_s1 + $0xc0] sm:$0xff] }
  0x12   :  { %3220 = vmatmul.mubr.msk.f32.gmra.mxu1 %vm122_vm0, %v51_v19  ;;  %3163 = vmatprep.mubr.msk.f32.mxu0 %vm122_vm0, %v91_v20  ;;  %v66_v49 = vld [vmem:[%s4706_s0 + $0xb0] sm:$0xff]  ;;  %v67_v51 = vld [vmem:[%s4706_s0 + $0xb8] sm:$0xff]  ;;  %v68_v53 = vld [vmem:[%s4706_s0 + $0xc0] sm:$0xff] }
  0x13   :  { %3222 = vmatprep.mubr.msk.f32.mxu1 %vm122_vm0, %v52_v21  ;;  %v108_v54 = vld [vmem:[%s4705_s1 + $0xc8] sm:$0xff]  ;;  %v109_v56 = vld [vmem:[%s4705_s1 + $0xd0] sm:$0xff]  ;;  %v110_v58 = vld [vmem:[%s4705_s1 + $0xd8] sm:$0xff] }
  0x14   :  { %v69_v55 = vld [vmem:[%s4706_s0 + $0xc8] sm:$0xff]  ;;  %v70_v57 = vld [vmem:[%s4706_s0 + $0xd0] sm:$0xff]  ;;  %v71_v59 = vld [vmem:[%s4706_s0 + $0xd8] sm:$0xff] }
  0x15   :  { %3164 = vmatmul.mubr.msk.f32.gmra.mxu0 %vm122_vm0, %v92_v22  ;;  %v111_v60 = vld [vmem:[%s4705_s1 + $0xe0] sm:$0xff]  ;;  %v112_v62 = vld [vmem:[%s4705_s1 + $0xe8] sm:$0xff]  ;;  %v113_v0 = vld [vmem:[%s4705_s1 + $0xf0] sm:$0xff] }
  0x16   :  { %3223 = vmatmul.mubr.msk.f32.gmra.mxu1 %vm122_vm0, %v53_v23  ;;  %3166 = vmatprep.mubr.msk.f32.mxu0 %vm122_vm0, %v93_v24  ;;  %v72_v61 = vld [vmem:[%s4706_s0 + $0xe0] sm:$0xff]  ;;  %v73_v63 = vld [vmem:[%s4706_s0 + $0xe8] sm:$0xff]  ;;  %v74_v1 = vld [vmem:[%s4706_s0 + $0xf0] sm:$0xff] }
  0x17   :  { %3225 = vmatprep.mubr.msk.f32.mxu1 %vm122_vm0, %v54_v25  ;;  %v114_v2 = vld [vmem:[%s4705_s1 + $0xf8] sm:$0xff]  ;;  %v115_v4 = vld [vmem:[%s4705_s1 + $0x100] sm:$0xff]  ;;  %v116_v6 = vld [vmem:[%s4705_s1 + $0x108] sm:$0xff] }
  0x18   :  { %v75_v3 = vld [vmem:[%s4706_s0 + $0xf8] sm:$0xff]  ;;  %v76_v5 = vld [vmem:[%s4706_s0 + $0x100] sm:$0xff]  ;;  %v77_v7 = vld [vmem:[%s4706_s0 + $0x108] sm:$0xff] }
  0x19   :  { %3167 = vmatmul.mubr.msk.f32.gmra.mxu0 %vm122_vm0, %v94_v26  ;;  %v117_v8 = vld [vmem:[%s4705_s1 + $0x110] sm:$0xff]  ;;  %v118_v10 = vld [vmem:[%s4705_s1 + $0x118] sm:$0xff]  ;;  %v119_v12 = vld [vmem:[%s4705_s1 + $0x120] sm:$0xff] }
  0x1a   :  { %3226 = vmatmul.mubr.msk.f32.gmra.mxu1 %vm122_vm0, %v55_v27  ;;  %3169 = vmatprep.mubr.msk.f32.mxu0 %vm122_vm0, %v95_v28  ;;  %v78_v9 = vld [vmem:[%s4706_s0 + $0x110] sm:$0xff]  ;;  %v79_v11 = vld [vmem:[%s4706_s0 + $0x118] sm:$0xff]  ;;  %v80_v13 = vld [vmem:[%s4706_s0 + $0x120] sm:$0xff] }
  0x1b   :  { %3228 = vmatprep.mubr.msk.f32.mxu1 %vm122_vm0, %v56_v29  ;;  %v120_v14 = vld [vmem:[%s4705_s1 + $0x128] sm:$0xff]  ;;  %v861_v16 = vld [vmem:[%s4709_s2] sm:$0xff]  ;;  %v863_v20 = vld [vmem:[%s4709_s2 + $0x10] sm:$0xff] }
  0x1c   :  { %v81_v15 = vld [vmem:[%s4706_s0 + $0x128] sm:$0xff]  ;;  %v1307_v17 = vld [vmem:[%s4710_s3] sm:$0xff]  ;;  %v1309_v21 = vld [vmem:[%s4710_s3 + $0x10] sm:$0xff] }
  0x1d   :  { %3170 = vmatmul.mubr.msk.f32.gmra.mxu0 %vm122_vm0, %v96_v30  ;;  %v862_v18 = vld [vmem:[%s4709_s2 + $0x8] sm:$0xff]  ;;  %v864_v22 = vld [vmem:[%s4709_s2 + $0x18] sm:$0xff]  ;;  %v865_v24 = vld [vmem:[%s4709_s2 + $0x20] sm:$0xff] }
  0x1e   :  { %3229 = vmatmul.mubr.msk.f32.gmra.mxu1 %vm122_vm0, %v57_v31  ;;  %3172 = vmatprep.mubr.msk.f32.mxu0 %vm122_vm0, %v97_v32  ;;  %v1308_v19 = vld [vmem:[%s4710_s3 + $0x8] sm:$0xff]  ;;  %v1310_v23 = vld [vmem:[%s4710_s3 + $0x18] sm:$0xff]  ;;  %v1311_v25 = vld [vmem:[%s4710_s3 + $0x20] sm:$0xff] }
  0x1f   :  { %3231 = vmatprep.mubr.msk.f32.mxu1 %vm122_vm0, %v58_v33  ;;  %v1839_v26 = vld [vmem:[%s4711_s9 + $0x18] sm:$0xff]  ;;  %v866_v27 = vld [vmem:[%s4709_s2 + $0x28] sm:$0xff]  ;;  %v867_v29 = vld [vmem:[%s4709_s2 + $0x30] sm:$0xff] }
  0x20   :  { %3385 = vmatprep.subr.mxu0 %v1839_v26  ;;  %v1312_v28 = vld [vmem:[%s4710_s3 + $0x28] sm:$0xff]  ;;  %v1313_v30 = vld [vmem:[%s4710_s3 + $0x30] sm:$0xff]  ;;  %v868_v31 = vld [vmem:[%s4709_s2 + $0x38] sm:$0xff] }
  0x21   :  { %3173 = vmatmul.mubr.msk.f32.gmra.mxu0 %vm122_vm0, %v98_v34  ;;  %v1314_v32 = vld [vmem:[%s4710_s3 + $0x38] sm:$0xff]  ;;  %v869_v33 = vld [vmem:[%s4709_s2 + $0x40] sm:$0xff] }
  0x22   :  { %3232 = vmatmul.mubr.msk.f32.gmra.mxu1 %vm122_vm0, %v59_v35  ;;  %3175 = vmatprep.mubr.msk.f32.mxu0 %vm122_vm0, %v99_v36  ;;  %v1315_v34 = vld [vmem:[%s4710_s3 + $0x40] sm:$0xff]  ;;  %v870_v35 = vld [vmem:[%s4709_s2 + $0x48] sm:$0xff] }
  0x23   :  { %3234 = vmatprep.mubr.msk.f32.mxu1 %vm122_vm0, %v60_v37  ;;  %v1316_v36 = vld [vmem:[%s4710_s3 + $0x48] sm:$0xff]  ;;  %v871_v37 = vld [vmem:[%s4709_s2 + $0x50] sm:$0xff] }
  0x25   :  { %3176 = vmatmul.mubr.msk.f32.gmra.mxu0 %vm122_vm0, %v100_v38  ;;  %v1317_v38 = vld [vmem:[%s4710_s3 + $0x50] sm:$0xff] }
  0x26   :  { %3235 = vmatmul.mubr.msk.f32.gmra.mxu1 %vm122_vm0, %v61_v39  ;;  %3178 = vmatprep.mubr.msk.f32.mxu0 %vm122_vm0, %v101_v40  ;;  %v872_v39 = vld [vmem:[%s4709_s2 + $0x58] sm:$0xff] }
  0x27   :  { %3237 = vmatprep.mubr.msk.f32.mxu1 %vm122_vm0, %v62_v41  ;;  %v1318_v40 = vld [vmem:[%s4710_s3 + $0x58] sm:$0xff]  ;;  %v873_v41 = vld [vmem:[%s4709_s2 + $0x60] sm:$0xff] }
  0x29   :  { %3179 = vmatmul.mubr.msk.f32.gmra.mxu0 %vm122_vm0, %v102_v42  ;;  %v1319_v42 = vld [vmem:[%s4710_s3 + $0x60] sm:$0xff] }
  0x2a   :  { %3238 = vmatmul.mubr.msk.f32.gmra.mxu1 %vm122_vm0, %v63_v43  ;;  %3181 = vmatprep.mubr.msk.f32.mxu0 %vm122_vm0, %v103_v44  ;;  %v1838_v43 = vld [vmem:[%s4711_s9 + $0x10] sm:$0xff]  ;;  %v874_v44 = vld [vmem:[%s4709_s2 + $0x68] sm:$0xff] }
  0x2b   :  { %3240 = vmatprep.mubr.msk.f32.mxu1 %vm122_vm0, %v64_v45  ;;  %v1320_v45 = vld [vmem:[%s4710_s3 + $0x68] sm:$0xff] }
  0x2d   :  { %3182 = vmatmul.mubr.msk.f32.gmra.mxu0 %vm122_vm0, %v104_v46  ;;  %v875_v46 = vld [vmem:[%s4709_s2 + $0x70] sm:$0xff] }
  0x2e   :  { %3241 = vmatmul.mubr.msk.f32.gmra.mxu1 %vm122_vm0, %v65_v47  ;;  %3184 = vmatprep.mubr.msk.f32.mxu0 %vm122_vm0, %v105_v48  ;;  %v1321_v47 = vld [vmem:[%s4710_s3 + $0x70] sm:$0xff]  ;;  %v876_v48 = vld [vmem:[%s4709_s2 + $0x78] sm:$0xff] }
  0x2f   :  { %3243 = vmatprep.mubr.msk.f32.mxu1 %vm122_vm0, %v66_v49  ;;  %v1322_v49 = vld [vmem:[%s4710_s3 + $0x78] sm:$0xff] }
  0x31   :  { %3185 = vmatmul.mubr.msk.f32.gmra.mxu0 %vm122_vm0, %v106_v50  ;;  %v877_v50 = vld [vmem:[%s4709_s2 + $0x80] sm:$0xff] }
  0x32   :  { %3244 = vmatmul.mubr.msk.f32.gmra.mxu1 %vm122_vm0, %v67_v51  ;;  %3187 = vmatprep.mubr.msk.f32.mxu0 %vm122_vm0, %v107_v52  ;;  %v1323_v51 = vld [vmem:[%s4710_s3 + $0x80] sm:$0xff]  ;;  %v878_v52 = vld [vmem:[%s4709_s2 + $0x88] sm:$0xff] }
  0x33   :  { %3246 = vmatprep.mubr.msk.f32.mxu1 %vm122_vm0, %v68_v53  ;;  %v1324_v53 = vld [vmem:[%s4710_s3 + $0x88] sm:$0xff] }
  0x35   :  { %3188 = vmatmul.mubr.msk.f32.gmra.mxu0 %vm122_vm0, %v108_v54  ;;  %v879_v54 = vld [vmem:[%s4709_s2 + $0x90] sm:$0xff] }
  0x36   :  { %3247 = vmatmul.mubr.msk.f32.gmra.mxu1 %vm122_vm0, %v69_v55  ;;  %3190 = vmatprep.mubr.msk.f32.mxu0 %vm122_vm0, %v109_v56  ;;  %v1325_v55 = vld [vmem:[%s4710_s3 + $0x90] sm:$0xff]  ;;  %v880_v56 = vld [vmem:[%s4709_s2 + $0x98] sm:$0xff] }
  0x37   :  { %3249 = vmatprep.mubr.msk.f32.mxu1 %vm122_vm0, %v70_v57  ;;  %v1326_v57 = vld [vmem:[%s4710_s3 + $0x98] sm:$0xff] }
  0x39   :  { %3191 = vmatmul.mubr.msk.f32.gmra.mxu0 %vm122_vm0, %v110_v58  ;;  %v881_v58 = vld [vmem:[%s4709_s2 + $0xa0] sm:$0xff] }
  0x3a   :  { %3250 = vmatmul.mubr.msk.f32.gmra.mxu1 %vm122_vm0, %v71_v59  ;;  %3193 = vmatprep.mubr.msk.f32.mxu0 %vm122_vm0, %v111_v60  ;;  %v1327_v59 = vld [vmem:[%s4710_s3 + $0xa0] sm:$0xff]  ;;  %v882_v60 = vld [vmem:[%s4709_s2 + $0xa8] sm:$0xff] }
  0x3b   :  { %3252 = vmatprep.mubr.msk.f32.mxu1 %vm122_vm0, %v72_v61  ;;  %v1328_v61 = vld [vmem:[%s4710_s3 + $0xa8] sm:$0xff] }
  0x3d   :  { %3194 = vmatmul.mubr.msk.f32.gmra.mxu0 %vm122_vm0, %v112_v62  ;;  %v883_v62 = vld [vmem:[%s4709_s2 + $0xb0] sm:$0xff] }
  0x3e   :  { %3253 = vmatmul.mubr.msk.f32.gmra.mxu1 %vm122_vm0, %v73_v63  ;;  %3196 = vmatprep.mubr.msk.f32.mxu0 %vm122_vm0, %v113_v0  ;;  %v1329_v63 = vld [vmem:[%s4710_s3 + $0xb0] sm:$0xff]  ;;  %v1837_v0 = vld [vmem:[%s4711_s9 + $0x8] sm:$0xff] }
  0x3f   :  { %3255 = vmatprep.mubr.msk.f32.mxu1 %vm122_vm0, %v74_v1  ;;  %v884_v1 = vld [vmem:[%s4709_s2 + $0xb8] sm:$0xff] }
  0x41   :  { %3197 = vmatmul.mubr.msk.f32.gmra.mxu0 %vm122_vm0, %v114_v2  ;;  %v1330_v2 = vld [vmem:[%s4710_s3 + $0xb8] sm:$0xff] }
  0x42   :  { %3256 = vmatmul.mubr.msk.f32.gmra.mxu1 %vm122_vm0, %v75_v3  ;;  %3199 = vmatprep.mubr.msk.f32.mxu0 %vm122_vm0, %v115_v4  ;;  %v885_v3 = vld [vmem:[%s4709_s2 + $0xc0] sm:$0xff] }
  0x43   :  { %3258 = vmatprep.mubr.msk.f32.mxu1 %vm122_vm0, %v76_v5  ;;  %v1331_v4 = vld [vmem:[%s4710_s3 + $0xc0] sm:$0xff]  ;;  %v886_v5 = vld [vmem:[%s4709_s2 + $0xc8] sm:$0xff] }
  0x45   :  { %3200 = vmatmul.mubr.msk.f32.gmra.mxu0 %vm122_vm0, %v116_v6  ;;  %v1332_v6 = vld [vmem:[%s4710_s3 + $0xc8] sm:$0xff] }
  0x46   :  { %3259 = vmatmul.mubr.msk.f32.gmra.mxu1 %vm122_vm0, %v77_v7  ;;  %3202 = vmatprep.mubr.msk.f32.mxu0 %vm122_vm0, %v117_v8  ;;  %v887_v7 = vld [vmem:[%s4709_s2 + $0xd0] sm:$0xff] }
  0x47   :  { %3261 = vmatprep.mubr.msk.f32.mxu1 %vm122_vm0, %v78_v9  ;;  %v1333_v8 = vld [vmem:[%s4710_s3 + $0xd0] sm:$0xff]  ;;  %v888_v9 = vld [vmem:[%s4709_s2 + $0xd8] sm:$0xff] }
  0x49   :  { %3203 = vmatmul.mubr.msk.f32.gmra.mxu0 %vm122_vm0, %v118_v10  ;;  %v1334_v10 = vld [vmem:[%s4710_s3 + $0xd8] sm:$0xff] }
  0x4a   :  { %3262 = vmatmul.mubr.msk.f32.gmra.mxu1 %vm122_vm0, %v79_v11  ;;  %3205 = vmatprep.mubr.msk.f32.mxu0 %vm122_vm0, %v119_v12  ;;  %v889_v11 = vld [vmem:[%s4709_s2 + $0xe0] sm:$0xff] }
  0x4b   :  { %3264 = vmatprep.mubr.msk.f32.mxu1 %vm122_vm0, %v80_v13  ;;  %v1335_v12 = vld [vmem:[%s4710_s3 + $0xe0] sm:$0xff]  ;;  %v890_v13 = vld [vmem:[%s4709_s2 + $0xe8] sm:$0xff] }
  0x4d   :  { %3206 = vmatmul.mubr.msk.f32.gmra.mxu0 %vm122_vm0, %v120_v14  ;;  %v1336_v14 = vld [vmem:[%s4710_s3 + $0xe8] sm:$0xff] }
  0x4e   :  { %3265 = vmatmul.mubr.msk.f32.gmra.mxu1 %vm122_vm0, %v81_v15  ;;  %3269 = vmatprep.mubr.msk.f32.mxu0 %vm122_vm0, %v861_v16  ;;  %v891_v15 = vld [vmem:[%s4709_s2 + $0xf0] sm:$0xff] }
  0x4f   :  { %3328 = vmatprep.mubr.msk.f32.mxu1 %vm122_vm0, %v1307_v17  ;;  %v1337_v16 = vld [vmem:[%s4710_s3 + $0xf0] sm:$0xff]  ;;  %v892_v17 = vld [vmem:[%s4709_s2 + $0xf8] sm:$0xff] }
  0x51   :  { %3270 = vmatmul.mubr.msk.f32.vlgmr.msra.gmra.mxu0 %vm122_vm0, %v862_v18  ;;  %v1338_v18 = vld [vmem:[%s4710_s3 + $0xf8] sm:$0xff] }
  0x52   :  { %3329 = vmatmul.mubr.msk.f32.vlgmr.msra.gmra.mxu1 %vm122_vm0, %v1308_v19  ;;  %3272 = vmatprep.mubr.msk.f32.mxu0 %vm122_vm0, %v863_v20  ;;  %v1836_v19 = vld [vmem:[%s4711_s9] sm:$0xff] }
  0x53   :  { %3331 = vmatprep.mubr.msk.f32.mxu1 %vm122_vm0, %v1309_v21  ;;  %3386 = vmatpush3.msra.mxu0 %v1839_v26  ;;  %v893_v20 = vld [vmem:[%s4709_s2 + $0x100] sm:$0xff]  ;;  %v896_v26 = vld [vmem:[%s4709_s2 + $0x118] sm:$0xff] }
  0x54   :  { %3387 = vmatprep.subr.mxu0 %v1838_v43  ;;  %v1339_v21 = vld [vmem:[%s4710_s3 + $0x100] sm:$0xff] }
  0x55   :  { %3273 = vmatmul.mubr.msk.f32.gmra.mxu0 %vm122_vm0, %v864_v22  ;;  %v894_v22 = vld [vmem:[%s4709_s2 + $0x108] sm:$0xff] }
  0x56   :  { %3332 = vmatmul.mubr.msk.f32.gmra.mxu1 %vm122_vm0, %v1310_v23  ;;  %3275 = vmatprep.mubr.msk.f32.mxu0 %vm122_vm0, %v865_v24  ;;  %v1340_v23 = vld [vmem:[%s4710_s3 + $0x108] sm:$0xff]  ;;  %v895_v24 = vld [vmem:[%s4709_s2 + $0x110] sm:$0xff] }
  0x57   :  { %3334 = vmatprep.mubr.msk.f32.mxu1 %vm122_vm0, %v1311_v25  ;;  %3388 = vmatpush3.msra.mxu0 %v1838_v43  ;;  %v1341_v25 = vld [vmem:[%s4710_s3 + $0x110] sm:$0xff] }
  0x58   :  { %3389 = vmatprep.subr.mxu0 %v1837_v0 }
  0x59   :  { %3276 = vmatmul.mubr.msk.f32.gmra.mxu0 %vm122_vm0, %v866_v27  ;;  %v1342_v27 = vld [vmem:[%s4710_s3 + $0x118] sm:$0xff] }
  0x5a   :  { %3335 = vmatmul.mubr.msk.f32.gmra.mxu1 %vm122_vm0, %v1312_v28  ;;  %3278 = vmatprep.mubr.msk.f32.mxu0 %vm122_vm0, %v867_v29  ;;  %v897_v28 = vld [vmem:[%s4709_s2 + $0x120] sm:$0xff] }
  0x5b   :  { %3337 = vmatprep.mubr.msk.f32.mxu1 %vm122_vm0, %v1313_v30  ;;  %3390 = vmatpush3.msra.mxu0 %v1837_v0  ;;  %v1343_v29 = vld [vmem:[%s4710_s3 + $0x120] sm:$0xff]  ;;  %v898_v30 = vld [vmem:[%s4709_s2 + $0x128] sm:$0xff] }
  0x5c   :  { %3391 = vmatprep.subr.mxu0 %v1836_v19 }
  0x5d   :  { %3279 = vmatmul.mubr.msk.f32.gmra.mxu0 %vm122_vm0, %v868_v31  ;;  %v1344_v31 = vld [vmem:[%s4710_s3 + $0x128] sm:$0xff] }
  0x5e   :  { %3338 = vmatmul.mubr.msk.f32.gmra.mxu1 %vm122_vm0, %v1314_v32  ;;  %3281 = vmatprep.mubr.msk.f32.mxu0 %vm122_vm0, %v869_v33 }
  0x5f   :  { %3340 = vmatprep.mubr.msk.f32.mxu1 %vm122_vm0, %v1315_v34  ;;  %3392 = vmatpush3.msra.mxu0 %v1836_v19  ;;  %v2257_v19 = vld [vmem:[%s4712_s11 + $0x10] sm:$0xff] }
  0x61   :  { %3282 = vmatmul.mubr.msk.f32.gmra.mxu0 %vm122_vm0, %v870_v35 }
  0x62   :  { %3341 = vmatmul.mubr.msk.f32.gmra.mxu1 %vm122_vm0, %v1316_v36  ;;  %3284 = vmatprep.mubr.msk.f32.mxu0 %vm122_vm0, %v871_v37 }
  0x63   :  { %3343 = vmatprep.mubr.msk.f32.mxu1 %vm122_vm0, %v1317_v38 }
  0x65   :  { %3285 = vmatmul.mubr.msk.f32.gmra.mxu0 %vm122_vm0, %v872_v39 }
  0x66   :  { %3344 = vmatmul.mubr.msk.f32.gmra.mxu1 %vm122_vm0, %v1318_v40  ;;  %3287 = vmatprep.mubr.msk.f32.mxu0 %vm122_vm0, %v873_v41 }
  0x67   :  { %3346 = vmatprep.mubr.msk.f32.mxu1 %vm122_vm0, %v1319_v42 }
  0x69   :  { %3288 = vmatmul.mubr.msk.f32.gmra.mxu0 %vm122_vm0, %v874_v44 }
  0x6a   :  { %3347 = vmatmul.mubr.msk.f32.gmra.mxu1 %vm122_vm0, %v1320_v45  ;;  %3290 = vmatprep.mubr.msk.f32.mxu0 %vm122_vm0, %v875_v46 }
  0x6b   :  { %3349 = vmatprep.mubr.msk.f32.mxu1 %vm122_vm0, %v1321_v47 }
  0x6d   :  { %3291 = vmatmul.mubr.msk.f32.gmra.mxu0 %vm122_vm0, %v876_v48 }
  0x6e   :  { %3350 = vmatmul.mubr.msk.f32.gmra.mxu1 %vm122_vm0, %v1322_v49  ;;  %3293 = vmatprep.mubr.msk.f32.mxu0 %vm122_vm0, %v877_v50 }
  0x6f   :  { %3352 = vmatprep.mubr.msk.f32.mxu1 %vm122_vm0, %v1323_v51 }
  0x71   :  { %3294 = vmatmul.mubr.msk.f32.gmra.mxu0 %vm122_vm0, %v878_v52 }
  0x72   :  { %3353 = vmatmul.mubr.msk.f32.gmra.mxu1 %vm122_vm0, %v1324_v53  ;;  %3296 = vmatprep.mubr.msk.f32.mxu0 %vm122_vm0, %v879_v54 }
  0x73   :  { %3355 = vmatprep.mubr.msk.f32.mxu1 %vm122_vm0, %v1325_v55 }
  0x75   :  { %3297 = vmatmul.mubr.msk.f32.gmra.mxu0 %vm122_vm0, %v880_v56 }
  0x76   :  { %3356 = vmatmul.mubr.msk.f32.gmra.mxu1 %vm122_vm0, %v1326_v57  ;;  %3299 = vmatprep.mubr.msk.f32.mxu0 %vm122_vm0, %v881_v58 }
  0x77   :  { %3358 = vmatprep.mubr.msk.f32.mxu1 %vm122_vm0, %v1327_v59 }
  0x79   :  { %3300 = vmatmul.mubr.msk.f32.gmra.mxu0 %vm122_vm0, %v882_v60 }
  0x7a   :  { %3359 = vmatmul.mubr.msk.f32.gmra.mxu1 %vm122_vm0, %v1328_v61  ;;  %3302 = vmatprep.mubr.msk.f32.mxu0 %vm122_vm0, %v883_v62 }
  0x7b   :  { %3361 = vmatprep.mubr.msk.f32.mxu1 %vm122_vm0, %v1329_v63 }
  0x7d   :  { %3303 = vmatmul.mubr.msk.f32.gmra.mxu0 %vm122_vm0, %v884_v1 }
  0x7e   :  { %3362 = vmatmul.mubr.msk.f32.gmra.mxu1 %vm122_vm0, %v1330_v2  ;;  %3305 = vmatprep.mubr.msk.f32.mxu0 %vm122_vm0, %v885_v3 }
  0x7f   :  { %3364 = vmatprep.mubr.msk.f32.mxu1 %vm122_vm0, %v1331_v4 }
  0x81   :  { %3306 = vmatmul.mubr.msk.f32.gmra.mxu0 %vm122_vm0, %v886_v5 }
  0x82   :  { %3365 = vmatmul.mubr.msk.f32.gmra.mxu1 %vm122_vm0, %v1332_v6  ;;  %3308 = vmatprep.mubr.msk.f32.mxu0 %vm122_vm0, %v887_v7 }
  0x83   :  { %3367 = vmatprep.mubr.msk.f32.mxu1 %vm122_vm0, %v1333_v8 }
  0x85   :  { %3309 = vmatmul.mubr.msk.f32.gmra.mxu0 %vm122_vm0, %v888_v9 }
  0x86   :  { %3368 = vmatmul.mubr.msk.f32.gmra.mxu1 %vm122_vm0, %v1334_v10  ;;  %3311 = vmatprep.mubr.msk.f32.mxu0 %vm122_vm0, %v889_v11 }
  0x87   :  { %3370 = vmatprep.mubr.msk.f32.mxu1 %vm122_vm0, %v1335_v12 }
  0x89   :  { %3312 = vmatmul.mubr.msk.f32.gmra.mxu0 %vm122_vm0, %v890_v13 }
  0x8a   :  { %3371 = vmatmul.mubr.msk.f32.gmra.mxu1 %vm122_vm0, %v1336_v14  ;;  %3314 = vmatprep.mubr.msk.f32.mxu0 %vm122_vm0, %v891_v15 }
  0x8b   :  { %3373 = vmatprep.mubr.msk.f32.mxu1 %vm122_vm0, %v1337_v16 }
  0x8d   :  { %3315 = vmatmul.mubr.msk.f32.gmra.mxu0 %vm122_vm0, %v892_v17 }
  0x8e   :  { %3374 = vmatmul.mubr.msk.f32.gmra.mxu1 %vm122_vm0, %v1338_v18  ;;  %3317 = vmatprep.mubr.msk.f32.mxu0 %vm122_vm0, %v893_v20  ;;  %v2258_v18 = vld [vmem:[%s4712_s11 + $0x18] sm:$0xff] }
  0x8f   :  { %3376 = vmatprep.mubr.msk.f32.mxu1 %vm122_vm0, %v1339_v21  ;;  %3450 = vmatprep.subr.mxu1 %v2258_v18 }
  0x90   :  { %3451 = vmatpush3.msra.mxu1 %v2258_v18 }
  0x91   :  { %3318 = vmatmul.mubr.msk.f32.gmra.mxu0 %vm122_vm0, %v894_v22  ;;  %3452 = vmatprep.subr.mxu1 %v2257_v19 }
  0x92   :  { %3377 = vmatmul.mubr.msk.f32.gmra.mxu1 %vm122_vm0, %v1340_v23  ;;  %3320 = vmatprep.mubr.msk.f32.mxu0 %vm122_vm0, %v895_v24  ;;  %v2256_v23 = vld [vmem:[%s4712_s11 + $0x8] sm:$0xff] }
  0x93   :  { %3379 = vmatprep.mubr.msk.f32.mxu1 %vm122_vm0, %v1341_v25  ;;  %3453 = vmatpush3.msra.mxu1 %v2257_v19 }
  0x94   :  { %3454 = vmatprep.subr.mxu1 %v2256_v23 }
  0x95   :  { %3321 = vmatmul.mubr.msk.f32.gmra.mxu0 %vm122_vm0, %v896_v26  ;;  %3455 = vmatpush3.msra.mxu1 %v2256_v23 }
  0x96   :  { %3380 = vmatmul.mubr.msk.f32.gmra.mxu1 %vm122_vm0, %v1342_v27  ;;  %3323 = vmatprep.mubr.msk.f32.mxu0 %vm122_vm0, %v897_v28  ;;  %v2255_v27 = vld [vmem:[%s4712_s11] sm:$0xff] }
  0x97   :  { %3382 = vmatprep.mubr.msk.f32.mxu1 %vm122_vm0, %v1343_v29  ;;  %3456 = vmatprep.subr.mxu1 %v2255_v27 }
  0x98   :  { %3457 = vmatpush3.msra.mxu1 %v2255_v27 }
  0x99   :  { %3324 = vmatmul.mubr.msk.f32.gmra.mxu0 %vm122_vm0, %v898_v30 }
  0x9a   :  { %3383 = vmatmul.mubr.msk.f32.gmra.mxu1 %vm122_vm0, %v1344_v31 }
  0xc5   :  { %v3153_v32 = vpop.f32.mrf.mxu0 }
  0xc6   :  { %v3212_v33 = vpop.f32.mrf.mxu1 }
  0xc7   :  { %v4217_v34 = vadd.f32 %v3212_v33, %v3153_v32  ;;  %v4219_v35 = vpop.f32.mrf.mxu0 }
  0xc8   :  { %v4221_v36 = vpop.f32.mrf.mxu1 }
  0xc9   :  { %v3156_v37 = vpop.f32.mrf.mxu0 }
  0xca   :  { %v3215_v38 = vpop.f32.mrf.mxu1 }
  0xcb   :  { %v4223_v39 = vadd.f32 %v3215_v38, %v3156_v37  ;;  %v313_v40 = vpop.f32.mrf.mxu0 }
  0xcc   :  { %v682_v41 = vpop.f32.mrf.mxu1 }
  0xcd   :  { %v4225_v42 = vadd.f32 %v682_v41, %v313_v40  ;;  %v3159_v43 = vpop.f32.mrf.mxu0 }
  0xce   :  { %v3218_v44 = vpop.f32.mrf.mxu1 }
  0xcf   :  { %v4227_v45 = vadd.f32 %v3218_v44, %v3159_v43  ;;  %v323_v46 = vpop.f32.mrf.mxu0 }
  0xd0   :  { %v692_v47 = vpop.f32.mrf.mxu1 }
  0xd1   :  { %v4229_v48 = vadd.f32 %v692_v47, %v323_v46  ;;  %v3162_v49 = vpop.f32.mrf.mxu0 }
  0xd2   :  { %v3221_v50 = vpop.f32.mrf.mxu1 }
  0xd3   :  { %v4231_v51 = vadd.f32 %v3221_v50, %v3162_v49  ;;  %v333_v52 = vpop.f32.mrf.mxu0 }
  0xd4   :  { %v702_v53 = vpop.f32.mrf.mxu1 }
  0xd5   :  { %v4233_v54 = vadd.f32 %v702_v53, %v333_v52  ;;  %v3165_v55 = vpop.f32.mrf.mxu0 }
  0xd6   :  { %v3224_v56 = vpop.f32.mrf.mxu1 }
  0xd7   :  { %v4235_v57 = vadd.f32 %v3224_v56, %v3165_v55  ;;  %v343_v58 = vpop.f32.mrf.mxu0 }
  0xd8   :  { %v712_v59 = vpop.f32.mrf.mxu1 }
  0xd9   :  { %v4237_v60 = vadd.f32 %v712_v59, %v343_v58  ;;  %v3168_v61 = vpop.f32.mrf.mxu0 }
  0xda   :  { %v3227_v62 = vpop.f32.mrf.mxu1 }
  0xdb   :  { %v4239_v63 = vadd.f32 %v3227_v62, %v3168_v61  ;;  %v353_v0 = vpop.f32.mrf.mxu0 }
  0xdc   :  { %v722_v1 = vpop.f32.mrf.mxu1 }
  0xdd   :  { %v4241_v2 = vadd.f32 %v722_v1, %v353_v0  ;;  %v3171_v3 = vpop.f32.mrf.mxu0 }
  0xde   :  { %v3230_v4 = vpop.f32.mrf.mxu1 }
  0xdf   :  { %v4243_v5 = vadd.f32 %v3230_v4, %v3171_v3  ;;  %v363_v6 = vpop.f32.mrf.mxu0 }
  0xe0   :  { %v732_v7 = vpop.f32.mrf.mxu1 }
  0xe1   :  { %v4245_v8 = vadd.f32 %v732_v7, %v363_v6  ;;  %v3174_v9 = vpop.f32.mrf.mxu0 }
  0xe2   :  { %v3233_v10 = vpop.f32.mrf.mxu1 }
  0xe3   :  { %v4247_v11 = vadd.f32 %v3233_v10, %v3174_v9  ;;  %v373_v12 = vpop.f32.mrf.mxu0 }
  0xe4   :  { %v742_v13 = vpop.f32.mrf.mxu1 }
  0xe5   :  { %v4249_v14 = vadd.f32 %v742_v13, %v373_v12  ;;  %v3177_v15 = vpop.f32.mrf.mxu0 }
  0xe6   :  { %v3236_v16 = vpop.f32.mrf.mxu1 }
  0xe7   :  { %v4251_v17 = vadd.f32 %v3236_v16, %v3177_v15  ;;  %v383_v20 = vpop.f32.mrf.mxu0 }
  0xe8   :  { %v752_v21 = vpop.f32.mrf.mxu1 }
  0xe9   :  { %v4259_v22 = vadd.f32 %v752_v21, %v383_v20  ;;  %v3180_v24 = vpop.f32.mrf.mxu0 }
  0xea   :  { %v3239_v25 = vpop.f32.mrf.mxu1 }
  0xeb   :  { %v4264_v26 = vadd.f32 %v3239_v25, %v3180_v24  ;;  %v393_v28 = vpop.f32.mrf.mxu0 }
  0xec   :  { %v762_v29 = vpop.f32.mrf.mxu1 }
  0xed   :  { %v4269_v30 = vadd.f32 %v762_v29, %v393_v28  ;;  %v3183_v31 = vpop.f32.mrf.mxu0 }
  0xee   :  { %v3242_v32 = vpop.f32.mrf.mxu1 }
  0xef   :  { %v4271_v33 = vadd.f32 %v3242_v32, %v3183_v31  ;;  %v403_v37 = vpop.f32.mrf.mxu0 }
  0xf0   :  { %v772_v38 = vpop.f32.mrf.mxu1 }
  0xf1   :  { %v4273_v40 = vadd.f32 %v772_v38, %v403_v37  ;;  %v3186_v41 = vpop.f32.mrf.mxu0 }
  0xf2   :  { %v3245_v43 = vpop.f32.mrf.mxu1 }
  0xf3   :  { %v4275_v44 = vadd.f32 %v3245_v43, %v3186_v41  ;;  %v413_v46 = vpop.f32.mrf.mxu0 }
  0xf4   :  { %v782_v47 = vpop.f32.mrf.mxu1 }
  0xf5   :  { %v4277_v49 = vadd.f32 %v782_v47, %v413_v46  ;;  %v3189_v50 = vpop.f32.mrf.mxu0 }
  0xf6   :  { %v3248_v52 = vpop.f32.mrf.mxu1 }
  0xf7   :  { %v4279_v53 = vadd.f32 %v3248_v52, %v3189_v50  ;;  %v423_v55 = vpop.f32.mrf.mxu0 }
  0xf8   :  { %v792_v56 = vpop.f32.mrf.mxu1 }
  0xf9   :  { %v4281_v58 = vadd.f32 %v792_v56, %v423_v55  ;;  %v3192_v59 = vpop.f32.mrf.mxu0 }
  0xfa   :  { %v3251_v61 = vpop.f32.mrf.mxu1 }
  0xfb   :  { %v4283_v62 = vadd.f32 %v3251_v61, %v3192_v59  ;;  %v433_v0 = vpop.f32.mrf.mxu0  ;;  %v673_v61 = vadd.f32 %v4221_v36, %v4219_v35 }
  0xfc   :  { %v802_v1 = vpop.f32.mrf.mxu1 }
  0xfd   :  { %v4285_v3 = vadd.f32 %v802_v1, %v433_v0  ;;  %v3195_v4 = vpop.f32.mrf.mxu0 }
  0xfe   :  { %v3254_v6 = vpop.f32.mrf.mxu1 }
  0xff   :  { %v4287_v7 = vadd.f32 %v3254_v6, %v3195_v4  ;;  %v443_v9 = vpop.f32.mrf.mxu0 }
 0x100   :  { %v812_v10 = vpop.f32.mrf.mxu1 }
 0x101   :  { %v4289_v12 = vadd.f32 %v812_v10, %v443_v9  ;;  %v3198_v13 = vpop.f32.mrf.mxu0  ;;  %v4313_v9 = vld [vmem:[%s4713_s8] ss:$0 sm:$0xff] }
 0x102   :  { %v3257_v15 = vpop.f32.mrf.mxu1 }
 0x103   :  { %v4291_v16 = vadd.f32 %v3257_v15, %v3198_v13  ;;  %v453_v18 = vpop.f32.mrf.mxu0 }
 0x104   :  { %v822_v19 = vpop.f32.mrf.mxu1 }
 0x105   :  { %v4293_v20 = vadd.f32 %v822_v19, %v453_v18  ;;  %v3201_v21 = vpop.f32.mrf.mxu0 }
 0x106   :  { %v3260_v23 = vpop.f32.mrf.mxu1 }
 0x107   :  { %v4295_v24 = vadd.f32 %v3260_v23, %v3201_v21  ;;  %v463_v25 = vpop.f32.mrf.mxu0 }
 0x108   :  { %v832_v27 = vpop.f32.mrf.mxu1 }
 0x109   :  { %v4297_v28 = vadd.f32 %v832_v27, %v463_v25  ;;  %v3204_v29 = vpop.f32.mrf.mxu0 }
 0x10a   :  { %v3263_v31 = vpop.f32.mrf.mxu1 }
 0x10b   :  { %v4299_v32 = vadd.f32 %v3263_v31, %v3204_v29  ;;  %v473_v37 = vpop.f32.mrf.mxu0 }
 0x10c   :  { %v842_v38 = vpop.f32.mrf.mxu1 }
 0x10d   :  { %v4301_v41 = vadd.f32 %v842_v38, %v473_v37  ;;  %v3207_v43 = vpop.f32.mrf.mxu0 }
 0x10e   :  { %v3266_v46 = vpop.f32.mrf.mxu1 }
 0x10f   :  { %v4303_v47 = vadd.f32 %v3266_v46, %v3207_v43  ;;  %v483_v50 = vpop.f32.mrf.mxu0 }
 0x110   :  { %v852_v52 = vpop.f32.mrf.mxu1 }
 0x111   :  { %v4305_v55 = vadd.f32 %v852_v52, %v483_v50  ;;  %v3271_v56 = vpop.f32.mrf.mxu0 }
 0x112   :  { %v3330_v59 = vpop.f32.mrf.mxu1  ;;  %v1270_v0 = vadd.f32 %v3271_v56, %v4217_v34 }
 0x113   :  { %v1080_v1 = vpop.f32.mrf.mxu0 }
 0x114   :  { %v1526_v4 = vpop.f32.mrf.mxu1  ;;  %v1716_v6 = vadd.f32 %v3330_v59, %v1270_v0  ;;  %v1269_v10 = vadd.f32 %v1080_v1, %v673_v61 }
 0x115   :  { %v3274_v13 = vpop.f32.mrf.mxu0 }
 0x116   :  { %v3333_v15 = vpop.f32.mrf.mxu1  ;;  %v1715_v18 = vadd.f32 %v1526_v4, %v1269_v10  ;;  %v1272_v19 = vadd.f32 %v3274_v13, %v4223_v39  ;;  %v1761_v21 = vadd.f32 %v4313_v9, %v1716_v6 }
 0x117   :  { %v1090_v23 = vpop.f32.mrf.mxu0 }
 0x118   :  { %v1536_v35 = vpop.f32.mrf.mxu1  ;;  %v1760_v34 = vadd.f32 %v4313_v9, %v1715_v18  ;;  %v1718_v36 = vadd.f32 %v3333_v15, %v1272_v19  ;;  %v1271_v25 = vadd.f32 %v1090_v23, %v4225_v42  ;;  %v1799_v43 = vmax.f32 %v1761_v21, 0.0 }
 0x119   :  { %v3277_v27 = vpop.f32.mrf.mxu0 }
 0x11a   :  { %v3336_v29 = vpop.f32.mrf.mxu1  ;;  %v1798_v31 = vmax.f32 %v1760_v34, 0.0  ;;  %v1717_v37 = vadd.f32 %v1536_v35, %v1271_v25  ;;  %v1274_v38 = vadd.f32 %v3277_v27, %v4227_v45  ;;  %v1763_v46 = vadd.f32 %v4313_v9, %v1718_v36 }
 0x11b   :  { %v1100_v39 = vpop.f32.mrf.mxu0 }
 0x11c   :  { %v1546_v50 = vpop.f32.mrf.mxu1  ;;  %v1762_v52 = vadd.f32 %v4313_v9, %v1717_v37  ;;  %v1720_v56 = vadd.f32 %v3336_v29, %v1274_v38  ;;  %v1273_v59 = vadd.f32 %v1100_v39, %v4229_v48  ;;  %3393 = vmatprep.mubr.msk.f32.mxu0 %vm1847_vm1, %v1798_v31  ;;  %v1801_v4 = vmax.f32 %v1763_v46, 0.0 }
 0x11d   :  { %v3280_v42 = vpop.f32.mrf.mxu0  ;;  %3394 = vmatmul.mubr.msk.f32.vlgmr.msra.gmra.mxu0 %vm1847_vm1, %v1799_v43 }
 0x11e   :  { %v3339_v61 = vpop.f32.mrf.mxu1  ;;  %v1800_v0 = vmax.f32 %v1762_v52, 0.0  ;;  %v1719_v1 = vadd.f32 %v1546_v50, %v1273_v59  ;;  %v1276_v45 = vadd.f32 %v3280_v42, %v4231_v51  ;;  %v1765_v6 = vadd.f32 %v4313_v9, %v1720_v56 }
 0x11f   :  { %v1110_v10 = vpop.f32.mrf.mxu0 }
 0x120   :  { %v1556_v13 = vpop.f32.mrf.mxu1  ;;  %v1764_v15 = vadd.f32 %v4313_v9, %v1719_v1  ;;  %v1722_v18 = vadd.f32 %v3339_v61, %v1276_v45  ;;  %v1275_v48 = vadd.f32 %v1110_v10, %v4233_v54  ;;  %3396 = vmatprep.mubr.msk.f32.mxu0 %vm1847_vm1, %v1800_v0  ;;  %v1803_v34 = vmax.f32 %v1765_v6, 0.0 }
 0x121   :  { %v3283_v19 = vpop.f32.mrf.mxu0  ;;  %3397 = vmatmul.mubr.msk.f32.gmra.mxu0 %vm1847_vm1, %v1801_v4 }
 0x122   :  { %v3342_v21 = vpop.f32.mrf.mxu1  ;;  %v1802_v23 = vmax.f32 %v1764_v15, 0.0  ;;  %v1721_v35 = vadd.f32 %v1556_v13, %v1275_v48  ;;  %v1278_v51 = vadd.f32 %v3283_v19, %v4235_v57  ;;  %v1767_v36 = vadd.f32 %v4313_v9, %v1722_v18 }
 0x123   :  { %v1120_v25 = vpop.f32.mrf.mxu0 }
 0x124   :  { %v1566_v27 = vpop.f32.mrf.mxu1  ;;  %v1766_v29 = vadd.f32 %v4313_v9, %v1721_v35  ;;  %v1724_v31 = vadd.f32 %v3342_v21, %v1278_v51  ;;  %v1277_v54 = vadd.f32 %v1120_v25, %v4237_v60  ;;  %3399 = vmatprep.mubr.msk.f32.mxu0 %vm1847_vm1, %v1802_v23  ;;  %v1805_v39 = vmax.f32 %v1767_v36, 0.0 }
 0x125   :  { %v3286_v37 = vpop.f32.mrf.mxu0  ;;  %3400 = vmatmul.mubr.msk.f32.gmra.mxu0 %vm1847_vm1, %v1803_v34 }
 0x126   :  { %v3345_v38 = vpop.f32.mrf.mxu1  ;;  %v1804_v43 = vmax.f32 %v1766_v29, 0.0  ;;  %v1723_v46 = vadd.f32 %v1566_v27, %v1277_v54  ;;  %v1280_v57 = vadd.f32 %v3286_v37, %v4239_v63  ;;  %v1769_v50 = vadd.f32 %v4313_v9, %v1724_v31 }
 0x127   :  { %v1130_v52 = vpop.f32.mrf.mxu0 }
 0x128   :  { %v1576_v56 = vpop.f32.mrf.mxu1  ;;  %v1768_v59 = vadd.f32 %v4313_v9, %v1723_v46  ;;  %v1726_v42 = vadd.f32 %v3345_v38, %v1280_v57  ;;  %v1279_v60 = vadd.f32 %v1130_v52, %v4241_v2  ;;  %3402 = vmatprep.mubr.msk.f32.mxu0 %vm1847_vm1, %v1804_v43  ;;  %v1807_v4 = vmax.f32 %v1769_v50, 0.0 }
 0x129   :  { %v3289_v61 = vpop.f32.mrf.mxu0  ;;  %3403 = vmatmul.mubr.msk.f32.gmra.mxu0 %vm1847_vm1, %v1805_v39 }
 0x12a   :  { %v3348_v0 = vpop.f32.mrf.mxu1  ;;  %v1806_v1 = vmax.f32 %v1768_v59, 0.0  ;;  %v1725_v45 = vadd.f32 %v1576_v56, %v1279_v60  ;;  %v1282_v63 = vadd.f32 %v3289_v61, %v4243_v5  ;;  %v1771_v6 = vadd.f32 %v4313_v9, %v1726_v42 }
 0x12b   :  { %v1140_v10 = vpop.f32.mrf.mxu0 }
 0x12c   :  { %v1586_v13 = vpop.f32.mrf.mxu1  ;;  %v1770_v15 = vadd.f32 %v4313_v9, %v1725_v45  ;;  %v1728_v18 = vadd.f32 %v3348_v0, %v1282_v63  ;;  %v1281_v2 = vadd.f32 %v1140_v10, %v4245_v8  ;;  %3405 = vmatprep.mubr.msk.f32.mxu0 %vm1847_vm1, %v1806_v1  ;;  %v1809_v35 = vmax.f32 %v1771_v6, 0.0 }
 0x12d   :  { %v3292_v48 = vpop.f32.mrf.mxu0  ;;  %3406 = vmatmul.mubr.msk.f32.gmra.mxu0 %vm1847_vm1, %v1807_v4 }
 0x12e   :  { %v3351_v19 = vpop.f32.mrf.mxu1  ;;  %v1808_v21 = vmax.f32 %v1770_v15, 0.0  ;;  %v1727_v23 = vadd.f32 %v1586_v13, %v1281_v2  ;;  %v1284_v5 = vadd.f32 %v3292_v48, %v4247_v11  ;;  %v1773_v51 = vadd.f32 %v4313_v9, %v1728_v18 }
 0x12f   :  { %v1150_v34 = vpop.f32.mrf.mxu0 }
 0x130   :  { %v1596_v36 = vpop.f32.mrf.mxu1  ;;  %v1772_v25 = vadd.f32 %v4313_v9, %v1727_v23  ;;  %v1730_v27 = vadd.f32 %v3351_v19, %v1284_v5  ;;  %v1283_v8 = vadd.f32 %v1150_v34, %v4249_v14  ;;  %3408 = vmatprep.mubr.msk.f32.mxu0 %vm1847_vm1, %v1808_v21  ;;  %v1811_v38 = vmax.f32 %v1773_v51, 0.0 }
 0x131   :  { %v3295_v29 = vpop.f32.mrf.mxu0  ;;  %3409 = vmatmul.mubr.msk.f32.gmra.mxu0 %vm1847_vm1, %v1809_v35 }
 0x132   :  { %v3354_v31 = vpop.f32.mrf.mxu1  ;;  %v1810_v54 = vmax.f32 %v1772_v25, 0.0  ;;  %v1729_v37 = vadd.f32 %v1596_v36, %v1283_v8  ;;  %v1286_v11 = vadd.f32 %v3295_v29, %v4251_v17  ;;  %v1775_v43 = vadd.f32 %v4313_v9, %v1730_v27 }
 0x133   :  { %v1160_v46 = vpop.f32.mrf.mxu0 }
 0x134   :  { %v1606_v57 = vpop.f32.mrf.mxu1  ;;  %v1774_v39 = vadd.f32 %v4313_v9, %v1729_v37  ;;  %v1732_v50 = vadd.f32 %v3354_v31, %v1286_v11  ;;  %v1285_v14 = vadd.f32 %v1160_v46, %v4259_v22  ;;  %3411 = vmatprep.mubr.msk.f32.mxu0 %vm1847_vm1, %v1810_v54  ;;  %v1813_v60 = vmax.f32 %v1775_v43, 0.0 }
 0x135   :  { %v3298_v52 = vpop.f32.mrf.mxu0  ;;  %3412 = vmatmul.mubr.msk.f32.gmra.mxu0 %vm1847_vm1, %v1811_v38 }
 0x136   :  { %v3357_v56 = vpop.f32.mrf.mxu1  ;;  %v1812_v59 = vmax.f32 %v1774_v39, 0.0  ;;  %v1731_v42 = vadd.f32 %v1606_v57, %v1285_v14  ;;  %v1288_v17 = vadd.f32 %v3298_v52, %v4264_v26  ;;  %v1777_v61 = vadd.f32 %v4313_v9, %v1732_v50 }
 0x137   :  { %v1170_v0 = vpop.f32.mrf.mxu0 }
 0x138   :  { %v1616_v1 = vpop.f32.mrf.mxu1  ;;  %v1776_v45 = vadd.f32 %v4313_v9, %v1731_v42  ;;  %v1734_v63 = vadd.f32 %v3357_v56, %v1288_v17  ;;  %v1287_v22 = vadd.f32 %v1170_v0, %v4269_v30  ;;  %3414 = vmatprep.mubr.msk.f32.mxu0 %vm1847_vm1, %v1812_v59  ;;  %v1815_v15 = vmax.f32 %v1777_v61, 0.0 }
 0x139   :  { %v3301_v4 = vpop.f32.mrf.mxu0  ;;  %3415 = vmatmul.mubr.msk.f32.gmra.mxu0 %vm1847_vm1, %v1813_v60 }
 0x13a   :  { %v3360_v6 = vpop.f32.mrf.mxu1  ;;  %v1814_v10 = vmax.f32 %v1776_v45, 0.0  ;;  %v1733_v13 = vadd.f32 %v1616_v1, %v1287_v22  ;;  %v1290_v26 = vadd.f32 %v3301_v4, %v4271_v33  ;;  %v1779_v18 = vadd.f32 %v4313_v9, %v1734_v63 }
 0x13b   :  { %v1180_v2 = vpop.f32.mrf.mxu0 }
 0x13c   :  { %v1626_v48 = vpop.f32.mrf.mxu1  ;;  %v1778_v19 = vadd.f32 %v4313_v9, %v1733_v13  ;;  %v1736_v21 = vadd.f32 %v3360_v6, %v1290_v26  ;;  %v1289_v30 = vadd.f32 %v1180_v2, %v4273_v40  ;;  %3417 = vmatprep.mubr.msk.f32.mxu0 %vm1847_vm1, %v1814_v10  ;;  %v1817_v34 = vmax.f32 %v1779_v18, 0.0 }
 0x13d   :  { %v3304_v23 = vpop.f32.mrf.mxu0  ;;  %3418 = vmatmul.mubr.msk.f32.gmra.mxu0 %vm1847_vm1, %v1815_v15 }
 0x13e   :  { %v3363_v5 = vpop.f32.mrf.mxu1  ;;  %v1816_v35 = vmax.f32 %v1778_v19, 0.0  ;;  %v1735_v51 = vadd.f32 %v1626_v48, %v1289_v30  ;;  %v1292_v33 = vadd.f32 %v3304_v23, %v4275_v44  ;;  %v1781_v36 = vadd.f32 %v4313_v9, %v1736_v21 }
 0x13f   :  { %v1190_v25 = vpop.f32.mrf.mxu0 }
 0x140   :  { %v1636_v27 = vpop.f32.mrf.mxu1  ;;  %v1780_v8 = vadd.f32 %v4313_v9, %v1735_v51  ;;  %v1738_v29 = vadd.f32 %v3363_v5, %v1292_v33  ;;  %v1291_v40 = vadd.f32 %v1190_v25, %v4277_v49  ;;  %3420 = vmatprep.mubr.msk.f32.mxu0 %vm1847_vm1, %v1816_v35  ;;  %v1819_v38 = vmax.f32 %v1781_v36, 0.0 }
 0x141   :  { %v3307_v31 = vpop.f32.mrf.mxu0  ;;  %3421 = vmatmul.mubr.msk.f32.gmra.mxu0 %vm1847_vm1, %v1817_v34 }
 0x142   :  { %v3366_v54 = vpop.f32.mrf.mxu1  ;;  %v1818_v37 = vmax.f32 %v1780_v8, 0.0  ;;  %v1737_v11 = vadd.f32 %v1636_v27, %v1291_v40  ;;  %v1294_v44 = vadd.f32 %v3307_v31, %v4279_v53  ;;  %v1783_v43 = vadd.f32 %v4313_v9, %v1738_v29 }
 0x143   :  { %v1200_v46 = vpop.f32.mrf.mxu0 }
 0x144   :  { %v1646_v57 = vpop.f32.mrf.mxu1  ;;  %v1782_v39 = vadd.f32 %v4313_v9, %v1737_v11  ;;  %v1740_v50 = vadd.f32 %v3366_v54, %v1294_v44  ;;  %v1293_v49 = vadd.f32 %v1200_v46, %v4281_v58  ;;  %3423 = vmatprep.mubr.msk.f32.mxu0 %vm1847_vm1, %v1818_v37  ;;  %v1821_v42 = vmax.f32 %v1783_v43, 0.0 }
 0x145   :  { %v3310_v14 = vpop.f32.mrf.mxu0  ;;  %3424 = vmatmul.mubr.msk.f32.gmra.mxu0 %vm1847_vm1, %v1819_v38 }
 0x146   :  { %v3369_v52 = vpop.f32.mrf.mxu1  ;;  %v1820_v56 = vmax.f32 %v1782_v39, 0.0  ;;  %v1739_v59 = vadd.f32 %v1646_v57, %v1293_v49  ;;  %v1296_v53 = vadd.f32 %v3310_v14, %v4283_v62  ;;  %v1785_v17 = vadd.f32 %v4313_v9, %v1740_v50 }
 0x147   :  { %v1210_v60 = vpop.f32.mrf.mxu0 }
 0x148   :  { %v1656_v61 = vpop.f32.mrf.mxu1  ;;  %v1784_v0 = vadd.f32 %v4313_v9, %v1739_v59  ;;  %v1742_v1 = vadd.f32 %v3369_v52, %v1296_v53  ;;  %v1295_v58 = vadd.f32 %v1210_v60, %v4285_v3  ;;  %3426 = vmatprep.mubr.msk.f32.mxu0 %vm1847_vm1, %v1820_v56  ;;  %v1823_v6 = vmax.f32 %v1785_v17, 0.0 }
 0x149   :  { %v3313_v45 = vpop.f32.mrf.mxu0  ;;  %3427 = vmatmul.mubr.msk.f32.gmra.mxu0 %vm1847_vm1, %v1821_v42 }
 0x14a   :  { %v3372_v63 = vpop.f32.mrf.mxu1  ;;  %v1822_v22 = vmax.f32 %v1784_v0, 0.0  ;;  %v1741_v4 = vadd.f32 %v1656_v61, %v1295_v58  ;;  %v1298_v62 = vadd.f32 %v3313_v45, %v4287_v7  ;;  %v1787_v10 = vadd.f32 %v4313_v9, %v1742_v1 }
 0x14b   :  { %v1220_v13 = vpop.f32.mrf.mxu0 }
 0x14c   :  { %v1666_v26 = vpop.f32.mrf.mxu1  ;;  %v1786_v15 = vadd.f32 %v4313_v9, %v1741_v4  ;;  %v1744_v18 = vadd.f32 %v3372_v63, %v1298_v62  ;;  %v1297_v3 = vadd.f32 %v1220_v13, %v4289_v12  ;;  %3429 = vmatprep.mubr.msk.f32.mxu0 %vm1847_vm1, %v1822_v22  ;;  %v1825_v30 = vmax.f32 %v1787_v10, 0.0 }
 0x14d   :  { %v3316_v2 = vpop.f32.mrf.mxu0  ;;  %3430 = vmatmul.mubr.msk.f32.gmra.mxu0 %vm1847_vm1, %v1823_v6 }
 0x14e   :  { %v3375_v48 = vpop.f32.mrf.mxu1  ;;  %v1824_v19 = vmax.f32 %v1786_v15, 0.0  ;;  %v1743_v21 = vadd.f32 %v1666_v26, %v1297_v3  ;;  %v1300_v7 = vadd.f32 %v3316_v2, %v4291_v16  ;;  %v1789_v23 = vadd.f32 %v4313_v9, %v1744_v18 }
 0x14f   :  { %v1230_v5 = vpop.f32.mrf.mxu0 }
 0x150   :  { %v1676_v35 = vpop.f32.mrf.mxu1  ;;  %v1788_v51 = vadd.f32 %v4313_v9, %v1743_v21  ;;  %v1746_v33 = vadd.f32 %v3375_v48, %v1300_v7  ;;  %v1299_v12 = vadd.f32 %v1230_v5, %v4293_v20  ;;  %3432 = vmatprep.mubr.msk.f32.mxu0 %vm1847_vm1, %v1824_v19  ;;  %v1827_v8 = vmax.f32 %v1789_v23, 0.0 }
 0x151   :  { %v3319_v34 = vpop.f32.mrf.mxu0  ;;  %3433 = vmatmul.mubr.msk.f32.gmra.mxu0 %vm1847_vm1, %v1825_v30 }
 0x152   :  { %v3378_v36 = vpop.f32.mrf.mxu1  ;;  %v1826_v25 = vmax.f32 %v1788_v51, 0.0  ;;  %v1745_v27 = vadd.f32 %v1676_v35, %v1299_v12  ;;  %v1302_v16 = vadd.f32 %v3319_v34, %v4295_v24  ;;  %v1791_v29 = vadd.f32 %v4313_v9, %v1746_v33 }
 0x153   :  { %v1240_v40 = vpop.f32.mrf.mxu0 }
 0x154   :  { %v1686_v31 = vpop.f32.mrf.mxu1  ;;  %v1790_v54 = vadd.f32 %v4313_v9, %v1745_v27  ;;  %v1748_v37 = vadd.f32 %v3378_v36, %v1302_v16  ;;  %v1301_v20 = vadd.f32 %v1240_v40, %v4297_v28  ;;  %3435 = vmatprep.mubr.msk.f32.mxu0 %vm1847_vm1, %v1826_v25  ;;  %v1829_v46 = vmax.f32 %v1791_v29, 0.0 }
 0x155   :  { %v3322_v11 = vpop.f32.mrf.mxu0  ;;  %3436 = vmatmul.mubr.msk.f32.gmra.mxu0 %vm1847_vm1, %v1827_v8 }
 0x156   :  { %v3381_v44 = vpop.f32.mrf.mxu1  ;;  %v1828_v38 = vmax.f32 %v1790_v54, 0.0  ;;  %v1747_v43 = vadd.f32 %v1686_v31, %v1301_v20  ;;  %v1304_v24 = vadd.f32 %v3322_v11, %v4299_v32  ;;  %v1793_v57 = vadd.f32 %v4313_v9, %v1748_v37 }
 0x157   :  { %v1250_v39 = vpop.f32.mrf.mxu0 }
 0x158   :  { %v1696_v50 = vpop.f32.mrf.mxu1  ;;  %v1792_v49 = vadd.f32 %v4313_v9, %v1747_v43  ;;  %v1750_v14 = vadd.f32 %v3381_v44, %v1304_v24  ;;  %v1303_v28 = vadd.f32 %v1250_v39, %v4301_v41  ;;  %3438 = vmatprep.mubr.msk.f32.mxu0 %vm1847_vm1, %v1828_v38  ;;  %v1831_v42 = vmax.f32 %v1793_v57, 0.0 }
 0x159   :  { %v3325_v52 = vpop.f32.mrf.mxu0  ;;  %3439 = vmatmul.mubr.msk.f32.gmra.mxu0 %vm1847_vm1, %v1829_v46 }
 0x15a   :  { %v3384_v56 = vpop.f32.mrf.mxu1  ;;  %v1830_v59 = vmax.f32 %v1792_v49, 0.0  ;;  %v1749_v53 = vadd.f32 %v1696_v50, %v1303_v28  ;;  %v1306_v32 = vadd.f32 %v3325_v52, %v4303_v47  ;;  %v1795_v17 = vadd.f32 %v4313_v9, %v1750_v14 }
 0x15b   :  { %v1260_v60 = vpop.f32.mrf.mxu0 }
 0x15c   :  { %v1794_v61 = vadd.f32 %v4313_v9, %v1749_v53  ;;  %v1752_v0 = vadd.f32 %v3384_v56, %v1306_v32  ;;  %v1305_v1 = vadd.f32 %v1260_v60, %v4305_v55  ;;  %3441 = vmatprep.mubr.msk.f32.mxu0 %vm1847_vm1, %v1830_v59  ;;  %v1706_v41 = vpop.f32.mrf.mxu1  ;;  %v1833_v63 = vmax.f32 %v1795_v17, 0.0  ;;  %v4430_v55 = vld [vmem:[%s4714_s10] ss:$0 sm:$0xff] }
 0x15d   :  { %3442 = vmatmul.mubr.msk.f32.gmra.mxu0 %vm1847_vm1, %v1831_v42 }
 0x15e   :  { %v1832_v58 = vmax.f32 %v1794_v61, 0.0  ;;  %v1751_v45 = vadd.f32 %v1706_v41, %v1305_v1  ;;  %v1797_v22 = vadd.f32 %v4313_v9, %v1752_v0 }
 0x160   :  { %v1796_v47 = vadd.f32 %v4313_v9, %v1751_v45  ;;  %3444 = vmatprep.mubr.msk.f32.mxu0 %vm1847_vm1, %v1832_v58  ;;  %v1835_v62 = vmax.f32 %v1797_v22, 0.0 }
 0x161   :  { %3445 = vmatmul.mubr.msk.f32.gmra.mxu0 %vm1847_vm1, %v1833_v63 }
 0x162   :  { %v1834_v4 = vmax.f32 %v1796_v47, 0.0 }
 0x164   :  { %3447 = vmatprep.mubr.msk.f32.mxu0 %vm1847_vm1, %v1834_v4 }
 0x165   :  { %3448 = vmatmul.mubr.msk.f32.gmra.mxu0 %vm1847_vm1, %v1835_v62 }
 0x1dd   :  { %v3395_v6 = vpop.f32.mrf.mxu0 }
 0x1de   :  { %v2034_v10 = vadd.f32 %v3395_v6, %v4430_v55 }
 0x1df   :  { %v2028_v13 = vpop.f32.mrf.mxu0 }
 0x1e0   :  { %v2029_v9 = vadd.f32 %v4430_v55, %v2028_v13  ;;  %v2218_v18 = vmax.f32 %v2034_v10, 0.0 }
 0x1e1   :  { %v3398_v26 = vpop.f32.mrf.mxu0 }
 0x1e2   :  { %v2217_v15 = vmax.f32 %v2029_v9, 0.0  ;;  %v2044_v3 = vadd.f32 %v3398_v26, %v4430_v55 }
 0x1e3   :  { %v2038_v2 = vpop.f32.mrf.mxu0 }
 0x1e4   :  { %v2039_v48 = vadd.f32 %v4430_v55, %v2038_v2  ;;  %3458 = vmatprep.mubr.msk.f32.mxu1 %vm1847_vm1, %v2217_v15  ;;  %v2220_v7 = vmax.f32 %v2044_v3, 0.0 }
 0x1e5   :  { %v3401_v19 = vpop.f32.mrf.mxu0  ;;  %3459 = vmatmul.mubr.msk.f32.vlgmr.msra.gmra.mxu1 %vm1847_vm1, %v2218_v18 }
 0x1e6   :  { %v2219_v21 = vmax.f32 %v2039_v48, 0.0  ;;  %v2054_v30 = vadd.f32 %v3401_v19, %v4430_v55 }
 0x1e7   :  { %v2048_v23 = vpop.f32.mrf.mxu0 }
 0x1e8   :  { %v2049_v5 = vadd.f32 %v4430_v55, %v2048_v23  ;;  %3461 = vmatprep.mubr.msk.f32.mxu1 %vm1847_vm1, %v2219_v21  ;;  %v2222_v33 = vmax.f32 %v2054_v30, 0.0 }
 0x1e9   :  { %v3404_v35 = vpop.f32.mrf.mxu0  ;;  %3462 = vmatmul.mubr.msk.f32.gmra.mxu1 %vm1847_vm1, %v2220_v7 }
 0x1ea   :  { %v2221_v51 = vmax.f32 %v2049_v5, 0.0  ;;  %v2064_v12 = vadd.f32 %v3404_v35, %v4430_v55 }
 0x1eb   :  { %v2058_v34 = vpop.f32.mrf.mxu0 }
 0x1ec   :  { %v2059_v36 = vadd.f32 %v4430_v55, %v2058_v34  ;;  %3464 = vmatprep.mubr.msk.f32.mxu1 %vm1847_vm1, %v2221_v51  ;;  %v2224_v16 = vmax.f32 %v2064_v12, 0.0 }
 0x1ed   :  { %v3407_v25 = vpop.f32.mrf.mxu0  ;;  %3465 = vmatmul.mubr.msk.f32.gmra.mxu1 %vm1847_vm1, %v2222_v33 }
 0x1ee   :  { %v2223_v27 = vmax.f32 %v2059_v36, 0.0  ;;  %v2074_v8 = vadd.f32 %v3407_v25, %v4430_v55 }
 0x1ef   :  { %v2068_v29 = vpop.f32.mrf.mxu0 }
 0x1f0   :  { %v2069_v40 = vadd.f32 %v4430_v55, %v2068_v29  ;;  %3467 = vmatprep.mubr.msk.f32.mxu1 %vm1847_vm1, %v2223_v27  ;;  %v2226_v37 = vmax.f32 %v2074_v8, 0.0 }
 0x1f1   :  { %v3410_v31 = vpop.f32.mrf.mxu0  ;;  %3468 = vmatmul.mubr.msk.f32.gmra.mxu1 %vm1847_vm1, %v2224_v16 }
 0x1f2   :  { %v2225_v54 = vmax.f32 %v2069_v40, 0.0  ;;  %v2084_v20 = vadd.f32 %v3410_v31, %v4430_v55 }
 0x1f3   :  { %v2078_v11 = vpop.f32.mrf.mxu0 }
 0x1f4   :  { %v2079_v44 = vadd.f32 %v4430_v55, %v2078_v11  ;;  %3470 = vmatprep.mubr.msk.f32.mxu1 %vm1847_vm1, %v2225_v54  ;;  %v2228_v24 = vmax.f32 %v2084_v20, 0.0 }
 0x1f5   :  { %v3413_v38 = vpop.f32.mrf.mxu0  ;;  %3471 = vmatmul.mubr.msk.f32.gmra.mxu1 %vm1847_vm1, %v2226_v37 }
 0x1f6   :  { %v2227_v43 = vmax.f32 %v2079_v44, 0.0  ;;  %v2094_v46 = vadd.f32 %v3413_v38, %v4430_v55 }
 0x1f7   :  { %v2088_v57 = vpop.f32.mrf.mxu0 }
 0x1f8   :  { %v2089_v39 = vadd.f32 %v4430_v55, %v2088_v57  ;;  %3473 = vmatprep.mubr.msk.f32.mxu1 %vm1847_vm1, %v2227_v43  ;;  %v2230_v14 = vmax.f32 %v2094_v46, 0.0 }
 0x1f9   :  { %v3416_v50 = vpop.f32.mrf.mxu0  ;;  %3474 = vmatmul.mubr.msk.f32.gmra.mxu1 %vm1847_vm1, %v2228_v24 }
 0x1fa   :  { %v2229_v49 = vmax.f32 %v2089_v39, 0.0  ;;  %v2104_v28 = vadd.f32 %v3416_v50, %v4430_v55 }
 0x1fb   :  { %v2098_v52 = vpop.f32.mrf.mxu0 }
 0x1fc   :  { %v2099_v56 = vadd.f32 %v4430_v55, %v2098_v52  ;;  %3476 = vmatprep.mubr.msk.f32.mxu1 %vm1847_vm1, %v2229_v49  ;;  %v2232_v32 = vmax.f32 %v2104_v28, 0.0 }
 0x1fd   :  { %v3419_v59 = vpop.f32.mrf.mxu0  ;;  %3477 = vmatmul.mubr.msk.f32.gmra.mxu1 %vm1847_vm1, %v2230_v14 }
 0x1fe   :  { %v2231_v53 = vmax.f32 %v2099_v56, 0.0  ;;  %v2114_v42 = vadd.f32 %v3419_v59, %v4430_v55 }
 0x1ff   :  { %v2108_v17 = vpop.f32.mrf.mxu0 }
 0x200   :  { %v2109_v60 = vadd.f32 %v4430_v55, %v2108_v17  ;;  %3479 = vmatprep.mubr.msk.f32.mxu1 %vm1847_vm1, %v2231_v53  ;;  %v2234_v1 = vmax.f32 %v2114_v42, 0.0 }
 0x201   :  { %v3422_v61 = vpop.f32.mrf.mxu0  ;;  %3480 = vmatmul.mubr.msk.f32.gmra.mxu1 %vm1847_vm1, %v2232_v32 }
 0x202   :  { %v2233_v0 = vmax.f32 %v2109_v60, 0.0  ;;  %v2124_v41 = vadd.f32 %v3422_v61, %v4430_v55  ;;  %v4511_v60 = vld [vmem:[%s4715_s12] ss:$0 sm:$0xff] }
 0x203   :  { %v2118_v58 = vpop.f32.mrf.mxu0 }
 0x204   :  { %v2119_v45 = vadd.f32 %v4430_v55, %v2118_v58  ;;  %3482 = vmatprep.mubr.msk.f32.mxu1 %vm1847_vm1, %v2233_v0  ;;  %v2236_v47 = vmax.f32 %v2124_v41, 0.0 }
 0x205   :  { %v3425_v63 = vpop.f32.mrf.mxu0  ;;  %3483 = vmatmul.mubr.msk.f32.gmra.mxu1 %vm1847_vm1, %v2234_v1 }
 0x206   :  { %v2235_v22 = vmax.f32 %v2119_v45, 0.0  ;;  %v2134_v4 = vadd.f32 %v3425_v63, %v4430_v55 }
 0x207   :  { %v2128_v62 = vpop.f32.mrf.mxu0 }
 0x208   :  { %v2129_v6 = vadd.f32 %v4430_v55, %v2128_v62  ;;  %3485 = vmatprep.mubr.msk.f32.mxu1 %vm1847_vm1, %v2235_v22  ;;  %v2238_v9 = vmax.f32 %v2134_v4, 0.0 }
 0x209   :  { %v3428_v10 = vpop.f32.mrf.mxu0  ;;  %3486 = vmatmul.mubr.msk.f32.gmra.mxu1 %vm1847_vm1, %v2236_v47 }
 0x20a   :  { %v2237_v13 = vmax.f32 %v2129_v6, 0.0  ;;  %v2144_v26 = vadd.f32 %v3428_v10, %v4430_v55 }
 0x20b   :  { %v2138_v15 = vpop.f32.mrf.mxu0 }
 0x20c   :  { %v2139_v18 = vadd.f32 %v4430_v55, %v2138_v15  ;;  %3488 = vmatprep.mubr.msk.f32.mxu1 %vm1847_vm1, %v2237_v13  ;;  %v2240_v48 = vmax.f32 %v2144_v26, 0.0 }
 0x20d   :  { %v3431_v3 = vpop.f32.mrf.mxu0  ;;  %3489 = vmatmul.mubr.msk.f32.gmra.mxu1 %vm1847_vm1, %v2238_v9 }
 0x20e   :  { %v2239_v2 = vmax.f32 %v2139_v18, 0.0  ;;  %v2154_v19 = vadd.f32 %v3431_v3, %v4430_v55 }
 0x20f   :  { %v2148_v21 = vpop.f32.mrf.mxu0 }
 0x210   :  { %v2149_v7 = vadd.f32 %v4430_v55, %v2148_v21  ;;  %3491 = vmatprep.mubr.msk.f32.mxu1 %vm1847_vm1, %v2239_v2  ;;  %v2242_v5 = vmax.f32 %v2154_v19, 0.0 }
 0x211   :  { %v3434_v30 = vpop.f32.mrf.mxu0  ;;  %3492 = vmatmul.mubr.msk.f32.gmra.mxu1 %vm1847_vm1, %v2240_v48 }
 0x212   :  { %v2241_v23 = vmax.f32 %v2149_v7, 0.0  ;;  %v2164_v35 = vadd.f32 %v3434_v30, %v4430_v55 }
 0x213   :  { %v2158_v51 = vpop.f32.mrf.mxu0 }
 0x214   :  { %v2159_v33 = vadd.f32 %v4430_v55, %v2158_v51  ;;  %3494 = vmatprep.mubr.msk.f32.mxu1 %vm1847_vm1, %v2241_v23  ;;  %v2244_v36 = vmax.f32 %v2164_v35, 0.0 }
 0x215   :  { %v3437_v12 = vpop.f32.mrf.mxu0  ;;  %3495 = vmatmul.mubr.msk.f32.gmra.mxu1 %vm1847_vm1, %v2242_v5 }
 0x216   :  { %v2243_v34 = vmax.f32 %v2159_v33, 0.0  ;;  %v2174_v25 = vadd.f32 %v3437_v12, %v4430_v55 }
 0x217   :  { %v2168_v27 = vpop.f32.mrf.mxu0 }
 0x218   :  { %v2169_v16 = vadd.f32 %v4430_v55, %v2168_v27  ;;  %3497 = vmatprep.mubr.msk.f32.mxu1 %vm1847_vm1, %v2243_v34  ;;  %v2246_v40 = vmax.f32 %v2174_v25, 0.0 }
 0x219   :  { %v3440_v8 = vpop.f32.mrf.mxu0  ;;  %3498 = vmatmul.mubr.msk.f32.gmra.mxu1 %vm1847_vm1, %v2244_v36 }
 0x21a   :  { %v2245_v29 = vmax.f32 %v2169_v16, 0.0  ;;  %v2184_v31 = vadd.f32 %v3440_v8, %v4430_v55 }
 0x21b   :  { %v2178_v54 = vpop.f32.mrf.mxu0 }
 0x21c   :  { %v2179_v37 = vadd.f32 %v4430_v55, %v2178_v54  ;;  %3500 = vmatprep.mubr.msk.f32.mxu1 %vm1847_vm1, %v2245_v29  ;;  %v2248_v44 = vmax.f32 %v2184_v31, 0.0 }
 0x21d   :  { %v3443_v20 = vpop.f32.mrf.mxu0  ;;  %3501 = vmatmul.mubr.msk.f32.gmra.mxu1 %vm1847_vm1, %v2246_v40 }
 0x21e   :  { %v2247_v11 = vmax.f32 %v2179_v37, 0.0  ;;  %v2194_v38 = vadd.f32 %v3443_v20, %v4430_v55 }
 0x21f   :  { %v2188_v43 = vpop.f32.mrf.mxu0 }
 0x220   :  { %v2189_v24 = vadd.f32 %v4430_v55, %v2188_v43  ;;  %3503 = vmatprep.mubr.msk.f32.mxu1 %vm1847_vm1, %v2247_v11  ;;  %v2250_v39 = vmax.f32 %v2194_v38, 0.0 }
 0x221   :  { %v3446_v46 = vpop.f32.mrf.mxu0  ;;  %3504 = vmatmul.mubr.msk.f32.gmra.mxu1 %vm1847_vm1, %v2248_v44 }
 0x222   :  { %v2249_v57 = vmax.f32 %v2189_v24, 0.0  ;;  %v2204_v50 = vadd.f32 %v3446_v46, %v4430_v55 }
 0x223   :  { %v2198_v49 = vpop.f32.mrf.mxu0 }
 0x224   :  { %v2199_v14 = vadd.f32 %v4430_v55, %v2198_v49  ;;  %3506 = vmatprep.mubr.msk.f32.mxu1 %vm1847_vm1, %v2249_v57  ;;  %v2252_v56 = vmax.f32 %v2204_v50, 0.0 }
 0x225   :  { %v3449_v28 = vpop.f32.mrf.mxu0  ;;  %3507 = vmatmul.mubr.msk.f32.gmra.mxu1 %vm1847_vm1, %v2250_v39 }
 0x226   :  { %v2251_v52 = vmax.f32 %v2199_v14, 0.0  ;;  %v2214_v59 = vadd.f32 %v3449_v28, %v4430_v55 }
 0x227   :  { %v2208_v53 = vpop.f32.mrf.mxu0 }
 0x228   :  { %v2209_v32 = vadd.f32 %v4430_v55, %v2208_v53  ;;  %3509 = vmatprep.mubr.msk.f32.mxu1 %vm1847_vm1, %v2251_v52  ;;  %v2254_v17 = vmax.f32 %v2214_v59, 0.0 }
 0x229   :  { %3510 = vmatmul.mubr.msk.f32.gmra.mxu1 %vm1847_vm1, %v2252_v56 }
 0x22a   :  { %v2253_v42 = vmax.f32 %v2209_v32, 0.0 }
 0x22c   :  { %3512 = vmatprep.mubr.msk.f32.mxu1 %vm1847_vm1, %v2253_v42 }
 0x22d   :  { %3513 = vmatmul.mubr.msk.f32.gmra.mxu1 %vm1847_vm1, %v2254_v17 }
 0x2a5   :  { %v3460_v61 = vpop.f32.mrf.mxu1 }
 0x2a6   :  { %v2452_v0 = vadd.f32 %v3460_v61, %v4511_v60 }
 0x2a7   :  { %v2446_v55 = vpop.f32.mrf.mxu1 }
 0x2a8   :  { %2637 = vst.msk [vmem:[%s4716_s13 + $0x8] sm:$0xff] %vm2635_vm2, %v2452_v0  ;;  %v2447_v1 = vadd.f32 %v4511_v60, %v2446_v55 }
 0x2a9   :  { %v3463_v41 = vpop.f32.mrf.mxu1 }
 0x2aa   :  { %2636 = vst.msk [vmem:[%s4716_s13] sm:$0xff] %vm2635_vm2, %v2447_v1  ;;  %v2462_v58 = vadd.f32 %v3463_v41, %v4511_v60 }
 0x2ab   :  { %v2456_v45 = vpop.f32.mrf.mxu1 }
 0x2ac   :  { %2639 = vst.msk [vmem:[%s4716_s13 + $0x18] sm:$0xff] %vm2635_vm2, %v2462_v58  ;;  %v2457_v63 = vadd.f32 %v4511_v60, %v2456_v45 }
 0x2ad   :  { %v3466_v22 = vpop.f32.mrf.mxu1 }
 0x2ae   :  { %2638 = vst.msk [vmem:[%s4716_s13 + $0x10] sm:$0xff] %vm2635_vm2, %v2457_v63  ;;  %v2472_v47 = vadd.f32 %v3466_v22, %v4511_v60 }
 0x2af   :  { %v2466_v4 = vpop.f32.mrf.mxu1 }
 0x2b0   :  { %2641 = vst.msk [vmem:[%s4716_s13 + $0x28] sm:$0xff] %vm2635_vm2, %v2472_v47  ;;  %v2467_v62 = vadd.f32 %v4511_v60, %v2466_v4 }
 0x2b1   :  { %v3469_v6 = vpop.f32.mrf.mxu1 }
 0x2b2   :  { %2640 = vst.msk [vmem:[%s4716_s13 + $0x20] sm:$0xff] %vm2635_vm2, %v2467_v62  ;;  %v2482_v10 = vadd.f32 %v3469_v6, %v4511_v60 }
 0x2b3   :  { %v2476_v13 = vpop.f32.mrf.mxu1 }
 0x2b4   :  { %2643 = vst.msk [vmem:[%s4716_s13 + $0x38] sm:$0xff] %vm2635_vm2, %v2482_v10  ;;  %v2477_v9 = vadd.f32 %v4511_v60, %v2476_v13 }
 0x2b5   :  { %v3472_v26 = vpop.f32.mrf.mxu1 }
 0x2b6   :  { %2642 = vst.msk [vmem:[%s4716_s13 + $0x30] sm:$0xff] %vm2635_vm2, %v2477_v9  ;;  %v2492_v15 = vadd.f32 %v3472_v26, %v4511_v60 }
 0x2b7   :  { %v2486_v18 = vpop.f32.mrf.mxu1 }
 0x2b8   :  { %2645 = vst.msk [vmem:[%s4716_s13 + $0x48] sm:$0xff] %vm2635_vm2, %v2492_v15  ;;  %v2487_v3 = vadd.f32 %v4511_v60, %v2486_v18 }
 0x2b9   :  { %v3475_v2 = vpop.f32.mrf.mxu1 }
 0x2ba   :  { %2644 = vst.msk [vmem:[%s4716_s13 + $0x40] sm:$0xff] %vm2635_vm2, %v2487_v3  ;;  %v2502_v48 = vadd.f32 %v3475_v2, %v4511_v60 }
 0x2bb   :  { %v2496_v19 = vpop.f32.mrf.mxu1 }
 0x2bc   :  { %2647 = vst.msk [vmem:[%s4716_s13 + $0x58] sm:$0xff] %vm2635_vm2, %v2502_v48  ;;  %v2497_v21 = vadd.f32 %v4511_v60, %v2496_v19 }
 0x2bd   :  { %v3478_v7 = vpop.f32.mrf.mxu1 }
 0x2be   :  { %2646 = vst.msk [vmem:[%s4716_s13 + $0x50] sm:$0xff] %vm2635_vm2, %v2497_v21  ;;  %v2512_v30 = vadd.f32 %v3478_v7, %v4511_v60 }
 0x2bf   :  { %v2506_v23 = vpop.f32.mrf.mxu1 }
 0x2c0   :  { %2649 = vst.msk [vmem:[%s4716_s13 + $0x68] sm:$0xff] %vm2635_vm2, %v2512_v30  ;;  %v2507_v5 = vadd.f32 %v4511_v60, %v2506_v23 }
 0x2c1   :  { %v3481_v35 = vpop.f32.mrf.mxu1 }
 0x2c2   :  { %2648 = vst.msk [vmem:[%s4716_s13 + $0x60] sm:$0xff] %vm2635_vm2, %v2507_v5  ;;  %v2522_v51 = vadd.f32 %v3481_v35, %v4511_v60 }
 0x2c3   :  { %v2516_v33 = vpop.f32.mrf.mxu1 }
 0x2c4   :  { %2651 = vst.msk [vmem:[%s4716_s13 + $0x78] sm:$0xff] %vm2635_vm2, %v2522_v51  ;;  %v2517_v12 = vadd.f32 %v4511_v60, %v2516_v33 }
 0x2c5   :  { %v3484_v34 = vpop.f32.mrf.mxu1 }
 0x2c6   :  { %2650 = vst.msk [vmem:[%s4716_s13 + $0x70] sm:$0xff] %vm2635_vm2, %v2517_v12  ;;  %v2532_v36 = vadd.f32 %v3484_v34, %v4511_v60 }
 0x2c7   :  { %v2526_v25 = vpop.f32.mrf.mxu1 }
 0x2c8   :  { %2653 = vst.msk [vmem:[%s4716_s13 + $0x88] sm:$0xff] %vm2635_vm2, %v2532_v36  ;;  %v2527_v27 = vadd.f32 %v4511_v60, %v2526_v25 }
 0x2c9   :  { %v3487_v16 = vpop.f32.mrf.mxu1 }
 0x2ca   :  { %2652 = vst.msk [vmem:[%s4716_s13 + $0x80] sm:$0xff] %vm2635_vm2, %v2527_v27  ;;  %v2542_v8 = vadd.f32 %v3487_v16, %v4511_v60 }
 0x2cb   :  { %v2536_v29 = vpop.f32.mrf.mxu1 }
 0x2cc   :  { %2655 = vst.msk [vmem:[%s4716_s13 + $0x98] sm:$0xff] %vm2635_vm2, %v2542_v8  ;;  %v2537_v40 = vadd.f32 %v4511_v60, %v2536_v29 }
 0x2cd   :  { %v3490_v31 = vpop.f32.mrf.mxu1 }
 0x2ce   :  { %2654 = vst.msk [vmem:[%s4716_s13 + $0x90] sm:$0xff] %vm2635_vm2, %v2537_v40  ;;  %v2552_v54 = vadd.f32 %v3490_v31, %v4511_v60 }
 0x2cf   :  { %v2546_v37 = vpop.f32.mrf.mxu1 }
 0x2d0   :  { %2657 = vst.msk [vmem:[%s4716_s13 + $0xa8] sm:$0xff] %vm2635_vm2, %v2552_v54  ;;  %v2547_v20 = vadd.f32 %v4511_v60, %v2546_v37 }
 0x2d1   :  { %v3493_v11 = vpop.f32.mrf.mxu1 }
 0x2d2   :  { %2656 = vst.msk [vmem:[%s4716_s13 + $0xa0] sm:$0xff] %vm2635_vm2, %v2547_v20  ;;  %v2562_v44 = vadd.f32 %v3493_v11, %v4511_v60 }
 0x2d3   :  { %v2556_v38 = vpop.f32.mrf.mxu1 }
 0x2d4   :  { %2659 = vst.msk [vmem:[%s4716_s13 + $0xb8] sm:$0xff] %vm2635_vm2, %v2562_v44  ;;  %v2557_v43 = vadd.f32 %v4511_v60, %v2556_v38 }
 0x2d5   :  { %v3496_v24 = vpop.f32.mrf.mxu1 }
 0x2d6   :  { %2658 = vst.msk [vmem:[%s4716_s13 + $0xb0] sm:$0xff] %vm2635_vm2, %v2557_v43  ;;  %v2572_v46 = vadd.f32 %v3496_v24, %v4511_v60 }
 0x2d7   :  { %v2566_v57 = vpop.f32.mrf.mxu1 }
 0x2d8   :  { %2661 = vst.msk [vmem:[%s4716_s13 + $0xc8] sm:$0xff] %vm2635_vm2, %v2572_v46  ;;  %v2567_v39 = vadd.f32 %v4511_v60, %v2566_v57 }
 0x2d9   :  { %v3499_v50 = vpop.f32.mrf.mxu1 }
 0x2da   :  { %2660 = vst.msk [vmem:[%s4716_s13 + $0xc0] sm:$0xff] %vm2635_vm2, %v2567_v39  ;;  %v2582_v49 = vadd.f32 %v3499_v50, %v4511_v60 }
 0x2db   :  { %v2576_v14 = vpop.f32.mrf.mxu1 }
 0x2dc   :  { %2663 = vst.msk [vmem:[%s4716_s13 + $0xd8] sm:$0xff] %vm2635_vm2, %v2582_v49  ;;  %v2577_v28 = vadd.f32 %v4511_v60, %v2576_v14 }
 0x2dd   :  { %v3502_v52 = vpop.f32.mrf.mxu1 }
 0x2de   :  { %2662 = vst.msk [vmem:[%s4716_s13 + $0xd0] sm:$0xff] %vm2635_vm2, %v2577_v28  ;;  %v2592_v56 = vadd.f32 %v3502_v52, %v4511_v60 }
 0x2df   :  { %v2586_v59 = vpop.f32.mrf.mxu1 }
 0x2e0   :  { %2665 = vst.msk [vmem:[%s4716_s13 + $0xe8] sm:$0xff] %vm2635_vm2, %v2592_v56  ;;  %v2587_v53 = vadd.f32 %v4511_v60, %v2586_v59 }
 0x2e1   :  { %v3505_v32 = vpop.f32.mrf.mxu1 }
 0x2e2   :  { %2664 = vst.msk [vmem:[%s4716_s13 + $0xe0] sm:$0xff] %vm2635_vm2, %v2587_v53  ;;  %v2602_v42 = vadd.f32 %v3505_v32, %v4511_v60 }
 0x2e3   :  { %v2596_v17 = vpop.f32.mrf.mxu1 }
 0x2e4   :  { %2667 = vst.msk [vmem:[%s4716_s13 + $0xf8] sm:$0xff] %vm2635_vm2, %v2602_v42  ;;  %v2597_v61 = vadd.f32 %v4511_v60, %v2596_v17 }
 0x2e5   :  { %v3508_v0 = vpop.f32.mrf.mxu1 }
 0x2e6   :  { %2666 = vst.msk [vmem:[%s4716_s13 + $0xf0] sm:$0xff] %vm2635_vm2, %v2597_v61  ;;  %v2612_v55 = vadd.f32 %v3508_v0, %v4511_v60 }
 0x2e7   :  { %v2606_v1 = vpop.f32.mrf.mxu1 }
 0x2e8   :  { %2669 = vst.msk [vmem:[%s4716_s13 + $0x108] sm:$0xff] %vm2635_vm2, %v2612_v55  ;;  %v2607_v41 = vadd.f32 %v4511_v60, %v2606_v1 }
 0x2e9   :  { %v3511_v58 = vpop.f32.mrf.mxu1 }
 0x2ea   :  { %2668 = vst.msk [vmem:[%s4716_s13 + $0x100] sm:$0xff] %vm2635_vm2, %v2607_v41  ;;  %v2622_v45 = vadd.f32 %v3511_v58, %v4511_v60 }
 0x2eb   :  { %v2616_v63 = vpop.f32.mrf.mxu1 }
 0x2ec   :  { %2671 = vst.msk [vmem:[%s4716_s13 + $0x118] sm:$0xff] %vm2635_vm2, %v2622_v45  ;;  %v2617_v22 = vadd.f32 %v4511_v60, %v2616_v63 }
 0x2ed   :  { %v3514_v47 = vpop.f32.mrf.mxu1 }
 0x2ee   :  { %2670 = vst.msk [vmem:[%s4716_s13 + $0x110] sm:$0xff] %vm2635_vm2, %v2617_v22  ;;  %v2632_v4 = vadd.f32 %v3514_v47, %v4511_v60 }
 0x2ef   :  { %v2626_v62 = vpop.f32.mrf.mxu1 }
 0x2f0   :  { %2673 = vst.msk [vmem:[%s4716_s13 + $0x128] sm:$0xff] %vm2635_vm2, %v2632_v4  ;;  %v2627_v6 = vadd.f32 %v4511_v60, %v2626_v62 }
 0x2f2   :  { %2672 = vst.msk [vmem:[%s4716_s13 + $0x120] sm:$0xff] %vm2635_vm2, %v2627_v6 }

</bundles_post_ra>
